<compile_context>
chip_gen: v7x
topology: tpu7x:2x2x1
jax: 0.10.0
libtpu: 0.0.40
codegen_flags: <defaults>
</compile_context>

<pallas_src>
import functools

import jax
import jax.numpy as jnp
from jax import lax
from jax.experimental import pallas as pl
from jax.experimental.pallas import tpu as pltpu

FEATURE_DIM = 29
LSTM_H_DIM = 128
ATTN_W_DIM = 64


def _largest_aligned_divisor(n, cap):
    t = cap - (cap % 8)
    while t >= 8:
        if n % t == 0:
            return t
        t -= 8
    return None


def _pick_n_tile(n, max_tile=256):
    """Sublane-aligned divisor of N capped at max_tile, preferring >= 2 grid steps
    (a length-1 'parallel' axis cannot be sharded across v7x's 2 TensorCores).
    Small / odd N falls back to the full dimension (always a legal block)."""
    if n % 8 != 0:
        return n
    t = _largest_aligned_divisor(n, min(max_tile, n))
    if t is None:
        return n
    if t == n and n >= 16:
        t2 = _largest_aligned_divisor(n, n // 2)
        if t2 is not None:
            return t2
    return t


# --------------------------------------------------------------------------
# Fused kernel: per step, one [x_t || h_{t-1}] @ [W_ih ; W_hh] contraction, gate
# nonlinearities, state update, and accumulation of h into the resident out tile.
# --------------------------------------------------------------------------
def _lstm_ha_fused_kernel(x_ref, w_ref, b_ref, out_ref, lhs_scr, *,
                          k_steps, hdim, fpad, nl_dtype):
    """x_ref: (K, TN, Fp) time-major.  w_ref: (H+Fp, 4H).  out_ref: (TN, H) = sum_k h_k.
    lhs_scr: persistent (TN, H+Fp) LHS; lanes [0,H) hold h, lanes [H,H+Fp) hold x_t."""
    tn = x_ref.shape[1]
    w_cat = w_ref[...]                          # [W_hh^T ; W_ih^T ; zero pad rows]
    bias = b_ref[...]                           # (1, 4H) f32; broadcast hoisted
    lhs_scr[...] = jnp.zeros_like(lhs_scr)      # h_0 = 0, x slot cleared
    out_ref[...] = jnp.zeros_like(out_ref)      # acc lives in the resident out tile

    def step(t, c):
        # Pack x_t next to h_{t-1}: a single 160-deep contraction replaces the old
        # separate 29-deep projection + 128-deep recurrence matmuls (1 MXU depth
        # pass on v6e/v7x's 256-deep MXU).
        lhs_scr[:, hdim:hdim + fpad] = x_ref[t]
        gates = jnp.dot(lhs_scr[...], w_cat,
                        preferred_element_type=jnp.float32) + bias
        g = gates.astype(nl_dtype)              # bf16 EUP on v6e/v7x, f32 on v5e
        i_g = jax.nn.sigmoid(g[:, 0 * hdim:1 * hdim])   # PyTorch gate order i,f,g,o
        f_g = jax.nn.sigmoid(g[:, 1 * hdim:2 * hdim])
        g_g = jnp.tanh(g[:, 2 * hdim:3 * hdim])
        o_g = jax.nn.sigmoid(g[:, 3 * hdim:4 * hdim])
        c = f_g * c + i_g * g_g                 # f32 cell state (only vreg carry)
        h = o_g * jnp.tanh(c)                   # f32 hidden state
        out_ref[...] += h                       # sum_k h_k == attention-head output
        lhs_scr[:, 0:hdim] = h.astype(lhs_scr.dtype)    # feed next step's matmul
        return c

    lax.fori_loop(0, k_steps, step, jnp.zeros((tn, hdim), jnp.float32),
                  unroll=(True if k_steps <= 32 else 4))


def lstm_ha_pallas(x_knf, w_cat, b, *, hdim, nl_dtype, max_n_tile=256):
    K, N, Fp = x_knf.shape
    D, G = w_cat.shape                          # D = H + Fp, G = 4*H
    tn = _pick_n_tile(N, max_n_tile)
    kernel = functools.partial(_lstm_ha_fused_kernel, k_steps=K, hdim=hdim,
                               fpad=Fp, nl_dtype=nl_dtype)
    return pl.pallas_call(
        kernel,
        out_shape=jax.ShapeDtypeStruct((N, hdim), jnp.float32),
        grid_spec=pltpu.PrefetchScalarGridSpec(
            num_scalar_prefetch=0,
            grid=(N // tn,),
            in_specs=[
                pl.BlockSpec((K, tn, Fp), lambda i: (0, i, 0)),   # x, time-major
                pl.BlockSpec((D, G), lambda i: (0, 0)),           # [W_hh^T ; W_ih^T]
                pl.BlockSpec((1, G), lambda i: (0, 0)),           # b_ih + b_hh
            ],
            out_specs=pl.BlockSpec((tn, hdim), lambda i: (i, 0)),
            # Persistent fused LHS only — the old (K, tn, 4H) f32 gate scratch is gone.
            scratch_shapes=[pltpu.VMEM((tn, D), x_knf.dtype)],
        ),
        compiler_params=pltpu.CompilerParams(
            dimension_semantics=("parallel",),    # N tiles independent (v7x 2 TCs)
            # VMEM now ~<1 MB/tile at tn=256 bf16; 32 MiB leaves huge headroom and
            # stays inside v7x's 64 MiB physical VMEM.
            vmem_limit_bytes=32 * 1024 * 1024,
        ),
    )(x_knf, w_cat, b)


# --------------------------------------------------------------------------
# Parameters (deterministic init, PyTorch-like uniform ranges) + forward glue.
# --------------------------------------------------------------------------
def init_params(key, f=FEATURE_DIM, h=LSTM_H_DIM, a=ATTN_W_DIM):
    ks = jax.random.split(key, 10)
    s = 1.0 / jnp.sqrt(h)
    w_ih = jax.random.uniform(ks[0], (4 * h, f), jnp.float32, -s, s)
    w_hh = jax.random.uniform(ks[1], (4 * h, h), jnp.float32, -s, s)
    b_ih = jax.random.uniform(ks[2], (4 * h,), jnp.float32, -s, s)
    b_hh = jax.random.uniform(ks[3], (4 * h,), jnp.float32, -s, s)
    wq = jax.random.uniform(ks[4], (a, h), jnp.float32, -s, s)
    bq = jax.random.uniform(ks[5], (a,), jnp.float32, -s, s)
    wk = jax.random.uniform(ks[6], (a, h), jnp.float32, -s, s)
    bk = jax.random.uniform(ks[7], (a,), jnp.float32, -s, s)
    ss = 1.0 / jnp.sqrt(a)
    ws = jax.random.uniform(ks[8], (1, a), jnp.float32, -ss, ss)
    bs = jax.random.uniform(ks[9], (1,), jnp.float32, -ss, ss)
    return dict(w_ih=w_ih, w_hh=w_hh, b_ih=b_ih, b_hh=b_hh,
                wq=wq, bq=bq, wk=wk, bk=bk, ws=ws, bs=bs)


def _nl_dtype_for_device(matmul_dtype):
    """bf16 transcendentals only where the VPU/EUP have a bf16 path (v6e/v7x)."""
    if jnp.dtype(matmul_dtype) != jnp.dtype(jnp.bfloat16):
        return jnp.float32
    try:
        kind = jax.devices()[0].device_kind.lower()
    except Exception:
        return jnp.float32
    for old in ("v2", "v3", "v4", "v5"):
        if old in kind:
            return jnp.float32          # v5e and older: no bf16 EUP/VPU
    return jnp.bfloat16


def lstm_ha_forward(x, p, *, matmul_dtype=jnp.bfloat16, max_n_tile=256):
    """x: (B, S, K, F) float32 -> (B, S, H).

    matmul_dtype (default bf16) casts only the MXU inputs (x, W_cat, h); accumulation,
    bias, cell state, output accumulation stay float32.  Gate nonlinearities run in
    bf16 on v6e/v7x, f32 elsewhere.
    """
    B, S, K, F = x.shape
    N = B * S
    H = p["w_hh"].shape[1]
    G = 4 * H
    # The kernel's sum-over-K shortcut is exact only because the score head outputs a
    # single logit (softmax over a size-1 axis == 1.0).
    assert p["ws"].shape[0] == 1, "score head must output 1 logit for the sum-over-K shortcut"

    fpad = ((F + 7) // 8) * 8                        # 29 -> 32
    d = H + fpad                                     # fused contraction depth (160)
    # Fused weight [W_hh^T ; W_ih^T ; zero pad] so per-step [x_t || h] needs one dot.
    w_cat = jnp.zeros((d, G), jnp.float32)
    w_cat = w_cat.at[:H].set(p["w_hh"].T)
    w_cat = w_cat.at[H:H + F].set(p["w_ih"].T)
    w_cat = w_cat.astype(matmul_dtype)
    b = (p["b_ih"] + p["b_hh"]).reshape(1, G).astype(jnp.float32)
    # Glue: flatten batch*stock, go time-major (dense leading-axis per-step reads),
    # zero-pad F to the fused slot width.
    x_knf = jnp.transpose(x.reshape(N, K, F), (1, 0, 2))
    x_knf = jnp.pad(x_knf, ((0, 0), (0, 0), (0, fpad - F))).astype(matmul_dtype)

    nl_dtype = _nl_dtype_for_device(matmul_dtype)
    out = lstm_ha_pallas(x_knf, w_cat, b, hdim=H, nl_dtype=nl_dtype,
                         max_n_tile=max_n_tile)      # (N, H)
    return out.reshape(B, S, H)


# --------------------------------------------------------------------------
# Pure-JAX reference: mirrors the full PyTorch forward, INCLUDING the complete
# attention head (query/key transforms, tanh, score linear, softmax over the
# size-1 axis, weighted sum) and the torch .reshape quirk.  This validates the
# fused kernel's "softmax(size-1) == 1" shortcut against the real module math.
# --------------------------------------------------------------------------
def reference_forward(x, p):
    B, S, K, F = x.shape
    N = B * S
    H = p["w_hh"].shape[1]
    xr = x.reshape(N, K, F)

    def step(carry, x_t):
        h, c = carry
        gates = x_t @ p["w_ih"].T + h @ p["w_hh"].T + p["b_ih"] + p["b_hh"]
        i_g = jax.nn.sigmoid(gates[:, 0 * H:1 * H])
        f_g = jax.nn.sigmoid(gates[:, 1 * H:2 * H])
        g_g = jnp.tanh(gates[:, 2 * H:3 * H])
        o_g = jax.nn.sigmoid(gates[:, 3 * H:4 * H])
        c = f_g * c + i_g * g_g
        h = o_g * jnp.tanh(c)
        return (h, c), h

    h0 = jnp.zeros((N, H), jnp.float32)
    c0 = jnp.zeros((N, H), jnp.float32)
    _, hs = lax.scan(step, (h0, c0), jnp.transpose(xr, (1, 0, 2)))
    outputs = jnp.transpose(hs, (1, 0, 2))                 # (N, K, H)
    k = outputs[:, -1, :]
    q = outputs.reshape(K, N, H)                           # torch .reshape quirk
    tq = q @ p["wq"].T + p["bq"]                           # (K, N, A)
    tk = k @ p["wk"].T + p["bk"]                           # (N, A)
    ai = (tk[None] + tq).reshape(-1, ATTN_W_DIM)
    sc = jnp.tanh(ai) @ p["ws"].T + p["bs"]                # (K*N, 1)
    qs = jax.nn.softmax(sc, axis=-1).reshape(N, K, 1)      # identically 1.0
    rep = jnp.sum(qs * outputs, axis=-2)
    return rep.reshape(B, S, H)


if __name__ == "__main__":
    key = jax.random.PRNGKey(0)
    kx, kp = jax.random.split(key)
    B, S, K = 2, 3, 8                       # batch, stocks, window
    x = jax.random.normal(kx, (B, S, K, FEATURE_DIM), jnp.float32)
    params = init_params(kp)

    ref = reference_forward(x, params)

    # f32 MXU path: tight correctness gate against the full-attention reference.
    out_f32 = jax.block_until_ready(lstm_ha_forward(x, params, matmul_dtype=jnp.float32))
    assert out_f32.shape == (B, S, LSTM_H_DIM), out_f32.shape
    err_f32 = float(jnp.max(jnp.abs(out_f32 - ref)))
    assert err_f32 < 5e-3, f"f32 kernel/reference mismatch: {err_f32}"

    # Default (bf16 MXU inputs, bf16 EUP where supported): looser sanity gate —
    # bf16 matmul inputs + bf16 nonlinearities compound over K steps of recurrence.
    out_bf16 = jax.block_until_ready(lstm_ha_forward(x, params))
    err_bf16 = float(jnp.max(jnp.abs(out_bf16 - ref)))
    assert err_bf16 < 1.5e-1, f"bf16 kernel/reference mismatch: {err_bf16}"

    print("KERNEL_OK")
</pallas_src>

<mosaic_0001>
module attributes {stable_mosaic.version = 11 : i64} {
  func.func @_lstm_ha_fused_kernel(%arg0: i32, %arg1: memref<8x6x32xf32, #tpu.memory_space<vmem>>, %arg2: memref<160x512xf32, #tpu.memory_space<vmem>>, %arg3: memref<1x512xf32, #tpu.memory_space<vmem>>, %arg4: memref<6x128xf32, #tpu.memory_space<vmem>>, %arg5: memref<6x160xf32, #tpu.memory_space<vmem>>) attributes {dimension_semantics = [#tpu.dimension_semantics<parallel>], iteration_bounds = array<i64: 1>, scalar_prefetch = 0 : i64, scratch_operands = 1 : i64, tpu.core_type = #tpu.core_type<tc>, window_params = [{transform_indices = @transform_0, window_bounds = array<i64: 8, 6, 32>}, {pipeline_mode = #tpu.pipeline_mode<synchronous>, transform_indices = @transform_1, window_bounds = array<i64: 160, 512>}, {pipeline_mode = #tpu.pipeline_mode<synchronous>, transform_indices = @transform_2, window_bounds = array<i64: 1, 512>}, {transform_indices = @transform_3, window_bounds = array<i64: 6, 128>}]} {
    %c0 = arith.constant 0 : index
    %c0_0 = arith.constant 0 : index
    %0 = vector.load %arg2[%c0, %c0_0] : memref<160x512xf32, #tpu.memory_space<vmem>>, vector<160x512xf32>
    %c0_1 = arith.constant 0 : index
    %c0_2 = arith.constant 0 : index
    %1 = vector.load %arg3[%c0_1, %c0_2] : memref<1x512xf32, #tpu.memory_space<vmem>>, vector<1x512xf32>
    %cst = arith.constant 0.000000e+00 : f32
    %2 = vector.broadcast %cst : f32 to vector<6x160xf32>
    %c0_3 = arith.constant 0 : index
    %c0_4 = arith.constant 0 : index
    %3 = vector.load %arg5[%c0_3, %c0_4] : memref<6x160xf32, #tpu.memory_space<vmem>>, vector<6x160xf32>
    tpu.vector_store %arg5[%c0_3, %c0_4], %2 {strides = array<i32>} : memref<6x160xf32, #tpu.memory_space<vmem>>, vector<6x160xf32>,
    %cst_5 = arith.constant 0.000000e+00 : f32
    %4 = vector.broadcast %cst_5 : f32 to vector<6x128xf32>
    %c0_6 = arith.constant 0 : index
    %c0_7 = arith.constant 0 : index
    %5 = vector.load %arg4[%c0_6, %c0_7] : memref<6x128xf32, #tpu.memory_space<vmem>>, vector<6x128xf32>
    tpu.vector_store %arg4[%c0_6, %c0_7], %4 {strides = array<i32>} : memref<6x128xf32, #tpu.memory_space<vmem>>, vector<6x128xf32>,
    %cst_8 = arith.constant 0.000000e+00 : f32
    %6 = vector.broadcast %cst_8 : f32 to vector<6x128xf32>
    %c0_i32 = arith.constant 0 : i32
    %7 = arith.index_cast %c0_i32 : i32 to index
    %c0_9 = arith.constant 0 : index
    %c0_10 = arith.constant 0 : index
    %8 = vector.load %arg1[%7, %c0_9, %c0_10] : memref<8x6x32xf32, #tpu.memory_space<vmem>>, vector<1x6x32xf32>
    %9 = vector.shape_cast %8 : vector<1x6x32xf32> to vector<6x32xf32>
    %c0_11 = arith.constant 0 : index
    %c128 = arith.constant 128 : index
    %10 = vector.load %arg5[%c0_11, %c128] : memref<6x160xf32, #tpu.memory_space<vmem>>, vector<6x32xf32>
    tpu.vector_store %arg5[%c0_11, %c128], %9 {strides = array<i32>} : memref<6x160xf32, #tpu.memory_space<vmem>>, vector<6x32xf32>,
    %c0_12 = arith.constant 0 : index
    %c0_13 = arith.constant 0 : index
    %11 = vector.load %arg5[%c0_12, %c0_13] : memref<6x160xf32, #tpu.memory_space<vmem>>, vector<6x160xf32>
    %cst_14 = arith.constant dense<0.000000e+00> : vector<6x512xf32>
    %12 = tpu.matmul %11, %0, %cst_14 {dimension_numbers = #tpu.dot_dimension_numbers<[1], [0], [0], [1], [0, 0, 1, 1], [], []>} : vector<6x160xf32>, vector<160x512xf32>, vector<6x512xf32> -> vector<6x512xf32>
    %13 = vector.broadcast %1 : vector<1x512xf32> to vector<6x512xf32>
    %14 = arith.addf %12, %13 : vector<6x512xf32>
    %15 = vector.extract_strided_slice %14 {offsets = [0, 0], sizes = [6, 128], strides = [1, 1]} : vector<6x512xf32> to vector<6x128xf32>
    %16 = arith.negf %15 : vector<6x128xf32>
    %17 = math.exp %16 : vector<6x128xf32>
    %cst_15 = arith.constant 1.000000e+00 : f32
    %18 = vector.broadcast %cst_15 : f32 to vector<6x128xf32>
    %19 = arith.addf %18, %17 : vector<6x128xf32>
    %20 = arith.divf %18, %19 : vector<6x128xf32>
    %21 = vector.extract_strided_slice %14 {offsets = [0, 128], sizes = [6, 128], strides = [1, 1]} : vector<6x512xf32> to vector<6x128xf32>
    %22 = arith.negf %21 : vector<6x128xf32>
    %23 = math.exp %22 : vector<6x128xf32>
    %cst_16 = arith.constant 1.000000e+00 : f32
    %24 = vector.broadcast %cst_16 : f32 to vector<6x128xf32>
    %25 = arith.addf %24, %23 : vector<6x128xf32>
    %26 = arith.divf %24, %25 : vector<6x128xf32>
    %27 = vector.extract_strided_slice %14 {offsets = [0, 256], sizes = [6, 128], strides = [1, 1]} : vector<6x512xf32> to vector<6x128xf32>
    %28 = math.tanh %27 : vector<6x128xf32>
    %29 = vector.extract_strided_slice %14 {offsets = [0, 384], sizes = [6, 128], strides = [1, 1]} : vector<6x512xf32> to vector<6x128xf32>
    %30 = arith.negf %29 : vector<6x128xf32>
    %31 = math.exp %30 : vector<6x128xf32>
    %cst_17 = arith.constant 1.000000e+00 : f32
    %32 = vector.broadcast %cst_17 : f32 to vector<6x128xf32>
    %33 = arith.addf %32, %31 : vector<6x128xf32>
    %34 = arith.divf %32, %33 : vector<6x128xf32>
    %35 = arith.mulf %26, %6 : vector<6x128xf32>
    %36 = arith.mulf %20, %28 : vector<6x128xf32>
    %37 = arith.addf %35, %36 : vector<6x128xf32>
    %38 = math.tanh %37 : vector<6x128xf32>
    %39 = arith.mulf %34, %38 : vector<6x128xf32>
    %c0_18 = arith.constant 0 : index
    %c0_19 = arith.constant 0 : index
    %40 = vector.load %arg4[%c0_18, %c0_19] : memref<6x128xf32, #tpu.memory_space<vmem>>, vector<6x128xf32>
    %41 = arith.addf %40, %39 : vector<6x128xf32>
    %c0_20 = arith.constant 0 : index
    %c0_21 = arith.constant 0 : index
    %42 = vector.load %arg4[%c0_20, %c0_21] : memref<6x128xf32, #tpu.memory_space<vmem>>, vector<6x128xf32>
    tpu.vector_store %arg4[%c0_20, %c0_21], %41 {strides = array<i32>} : memref<6x128xf32, #tpu.memory_space<vmem>>, vector<6x128xf32>,
    %c0_22 = arith.constant 0 : index
    %c0_23 = arith.constant 0 : index
    %43 = vector.load %arg5[%c0_22, %c0_23] : memref<6x160xf32, #tpu.memory_space<vmem>>, vector<6x128xf32>
    tpu.vector_store %arg5[%c0_22, %c0_23], %39 {strides = array<i32>} : memref<6x160xf32, #tpu.memory_space<vmem>>, vector<6x128xf32>,
    %c1_i32 = arith.constant 1 : i32
    %44 = arith.index_cast %c1_i32 : i32 to index
    %c0_24 = arith.constant 0 : index
    %c0_25 = arith.constant 0 : index
    %45 = vector.load %arg1[%44, %c0_24, %c0_25] : memref<8x6x32xf32, #tpu.memory_space<vmem>>, vector<1x6x32xf32>
    %46 = vector.shape_cast %45 : vector<1x6x32xf32> to vector<6x32xf32>
    %c0_26 = arith.constant 0 : index
    %c128_27 = arith.constant 128 : index
    %47 = vector.load %arg5[%c0_26, %c128_27] : memref<6x160xf32, #tpu.memory_space<vmem>>, vector<6x32xf32>
    tpu.vector_store %arg5[%c0_26, %c128_27], %46 {strides = array<i32>} : memref<6x160xf32, #tpu.memory_space<vmem>>, vector<6x32xf32>,
    %c0_28 = arith.constant 0 : index
    %c0_29 = arith.constant 0 : index
    %48 = vector.load %arg5[%c0_28, %c0_29] : memref<6x160xf32, #tpu.memory_space<vmem>>, vector<6x160xf32>
    %cst_30 = arith.constant dense<0.000000e+00> : vector<6x512xf32>
    %49 = tpu.matmul %48, %0, %cst_30 {dimension_numbers = #tpu.dot_dimension_numbers<[1], [0], [0], [1], [0, 0, 1, 1], [], []>} : vector<6x160xf32>, vector<160x512xf32>, vector<6x512xf32> -> vector<6x512xf32>
    %50 = vector.broadcast %1 : vector<1x512xf32> to vector<6x512xf32>
    %51 = arith.addf %49, %50 : vector<6x512xf32>
    %52 = vector.extract_strided_slice %51 {offsets = [0, 0], sizes = [6, 128], strides = [1, 1]} : vector<6x512xf32> to vector<6x128xf32>
    %53 = arith.negf %52 : vector<6x128xf32>
    %54 = math.exp %53 : vector<6x128xf32>
    %cst_31 = arith.constant 1.000000e+00 : f32
    %55 = vector.broadcast %cst_31 : f32 to vector<6x128xf32>
    %56 = arith.addf %55, %54 : vector<6x128xf32>
    %57 = arith.divf %55, %56 : vector<6x128xf32>
    %58 = vector.extract_strided_slice %51 {offsets = [0, 128], sizes = [6, 128], strides = [1, 1]} : vector<6x512xf32> to vector<6x128xf32>
    %59 = arith.negf %58 : vector<6x128xf32>
    %60 = math.exp %59 : vector<6x128xf32>
    %cst_32 = arith.constant 1.000000e+00 : f32
    %61 = vector.broadcast %cst_32 : f32 to vector<6x128xf32>
    %62 = arith.addf %61, %60 : vector<6x128xf32>
    %63 = arith.divf %61, %62 : vector<6x128xf32>
    %64 = vector.extract_strided_slice %51 {offsets = [0, 256], sizes = [6, 128], strides = [1, 1]} : vector<6x512xf32> to vector<6x128xf32>
    %65 = math.tanh %64 : vector<6x128xf32>
    %66 = vector.extract_strided_slice %51 {offsets = [0, 384], sizes = [6, 128], strides = [1, 1]} : vector<6x512xf32> to vector<6x128xf32>
    %67 = arith.negf %66 : vector<6x128xf32>
    %68 = math.exp %67 : vector<6x128xf32>
    %cst_33 = arith.constant 1.000000e+00 : f32
    %69 = vector.broadcast %cst_33 : f32 to vector<6x128xf32>
    %70 = arith.addf %69, %68 : vector<6x128xf32>
    %71 = arith.divf %69, %70 : vector<6x128xf32>
    %72 = arith.mulf %63, %37 : vector<6x128xf32>
    %73 = arith.mulf %57, %65 : vector<6x128xf32>
    %74 = arith.addf %72, %73 : vector<6x128xf32>
    %75 = math.tanh %74 : vector<6x128xf32>
    %76 = arith.mulf %71, %75 : vector<6x128xf32>
    %c0_34 = arith.constant 0 : index
    %c0_35 = arith.constant 0 : index
    %77 = vector.load %arg4[%c0_34, %c0_35] : memref<6x128xf32, #tpu.memory_space<vmem>>, vector<6x128xf32>
    %78 = arith.addf %77, %76 : vector<6x128xf32>
    %c0_36 = arith.constant 0 : index
    %c0_37 = arith.constant 0 : index
    %79 = vector.load %arg4[%c0_36, %c0_37] : memref<6x128xf32, #tpu.memory_space<vmem>>, vector<6x128xf32>
    tpu.vector_store %arg4[%c0_36, %c0_37], %78 {strides = array<i32>} : memref<6x128xf32, #tpu.memory_space<vmem>>, vector<6x128xf32>,
    %c0_38 = arith.constant 0 : index
    %c0_39 = arith.constant 0 : index
    %80 = vector.load %arg5[%c0_38, %c0_39] : memref<6x160xf32, #tpu.memory_space<vmem>>, vector<6x128xf32>
    tpu.vector_store %arg5[%c0_38, %c0_39], %76 {strides = array<i32>} : memref<6x160xf32, #tpu.memory_space<vmem>>, vector<6x128xf32>,
    %c2_i32 = arith.constant 2 : i32
    %81 = arith.index_cast %c2_i32 : i32 to index
    %c0_40 = arith.constant 0 : index
    %c0_41 = arith.constant 0 : index
    %82 = vector.load %arg1[%81, %c0_40, %c0_41] : memref<8x6x32xf32, #tpu.memory_space<vmem>>, vector<1x6x32xf32>
    %83 = vector.shape_cast %82 : vector<1x6x32xf32> to vector<6x32xf32>
    %c0_42 = arith.constant 0 : index
    %c128_43 = arith.constant 128 : index
    %84 = vector.load %arg5[%c0_42, %c128_43] : memref<6x160xf32, #tpu.memory_space<vmem>>, vector<6x32xf32>
    tpu.vector_store %arg5[%c0_42, %c128_43], %83 {strides = array<i32>} : memref<6x160xf32, #tpu.memory_space<vmem>>, vector<6x32xf32>,
    %c0_44 = arith.constant 0 : index
    %c0_45 = arith.constant 0 : index
    %85 = vector.load %arg5[%c0_44, %c0_45] : memref<6x160xf32, #tpu.memory_space<vmem>>, vector<6x160xf32>
    %cst_46 = arith.constant dense<0.000000e+00> : vector<6x512xf32>
    %86 = tpu.matmul %85, %0, %cst_46 {dimension_numbers = #tpu.dot_dimension_numbers<[1], [0], [0], [1], [0, 0, 1, 1], [], []>} : vector<6x160xf32>, vector<160x512xf32>, vector<6x512xf32> -> vector<6x512xf32>
    %87 = vector.broadcast %1 : vector<1x512xf32> to vector<6x512xf32>
    %88 = arith.addf %86, %87 : vector<6x512xf32>
    %89 = vector.extract_strided_slice %88 {offsets = [0, 0], sizes = [6, 128], strides = [1, 1]} : vector<6x512xf32> to vector<6x128xf32>
    %90 = arith.negf %89 : vector<6x128xf32>
    %91 = math.exp %90 : vector<6x128xf32>
    %cst_47 = arith.constant 1.000000e+00 : f32
    %92 = vector.broadcast %cst_47 : f32 to vector<6x128xf32>
    %93 = arith.addf %92, %91 : vector<6x128xf32>
    %94 = arith.divf %92, %93 : vector<6x128xf32>
    %95 = vector.extract_strided_slice %88 {offsets = [0, 128], sizes = [6, 128], strides = [1, 1]} : vector<6x512xf32> to vector<6x128xf32>
    %96 = arith.negf %95 : vector<6x128xf32>
    %97 = math.exp %96 : vector<6x128xf32>
    %cst_48 = arith.constant 1.000000e+00 : f32
    %98 = vector.broadcast %cst_48 : f32 to vector<6x128xf32>
    %99 = arith.addf %98, %97 : vector<6x128xf32>
    %100 = arith.divf %98, %99 : vector<6x128xf32>
    %101 = vector.extract_strided_slice %88 {offsets = [0, 256], sizes = [6, 128], strides = [1, 1]} : vector<6x512xf32> to vector<6x128xf32>
    %102 = math.tanh %101 : vector<6x128xf32>
    %103 = vector.extract_strided_slice %88 {offsets = [0, 384], sizes = [6, 128], strides = [1, 1]} : vector<6x512xf32> to vector<6x128xf32>
    %104 = arith.negf %103 : vector<6x128xf32>
    %105 = math.exp %104 : vector<6x128xf32>
    %cst_49 = arith.constant 1.000000e+00 : f32
    %106 = vector.broadcast %cst_49 : f32 to vector<6x128xf32>
    %107 = arith.addf %106, %105 : vector<6x128xf32>
    %108 = arith.divf %106, %107 : vector<6x128xf32>
    %109 = arith.mulf %100, %74 : vector<6x128xf32>
    %110 = arith.mulf %94, %102 : vector<6x128xf32>
    %111 = arith.addf %109, %110 : vector<6x128xf32>
    %112 = math.tanh %111 : vector<6x128xf32>
    %113 = arith.mulf %108, %112 : vector<6x128xf32>
    %c0_50 = arith.constant 0 : index
    %c0_51 = arith.constant 0 : index
    %114 = vector.load %arg4[%c0_50, %c0_51] : memref<6x128xf32, #tpu.memory_space<vmem>>, vector<6x128xf32>
    %115 = arith.addf %114, %113 : vector<6x128xf32>
    %c0_52 = arith.constant 0 : index
    %c0_53 = arith.constant 0 : index
    %116 = vector.load %arg4[%c0_52, %c0_53] : memref<6x128xf32, #tpu.memory_space<vmem>>, vector<6x128xf32>
    tpu.vector_store %arg4[%c0_52, %c0_53], %115 {strides = array<i32>} : memref<6x128xf32, #tpu.memory_space<vmem>>, vector<6x128xf32>,
    %c0_54 = arith.constant 0 : index
    %c0_55 = arith.constant 0 : index
    %117 = vector.load %arg5[%c0_54, %c0_55] : memref<6x160xf32, #tpu.memory_space<vmem>>, vector<6x128xf32>
    tpu.vector_store %arg5[%c0_54, %c0_55], %113 {strides = array<i32>} : memref<6x160xf32, #tpu.memory_space<vmem>>, vector<6x128xf32>,
    %c3_i32 = arith.constant 3 : i32
    %118 = arith.index_cast %c3_i32 : i32 to index
    %c0_56 = arith.constant 0 : index
    %c0_57 = arith.constant 0 : index
    %119 = vector.load %arg1[%118, %c0_56, %c0_57] : memref<8x6x32xf32, #tpu.memory_space<vmem>>, vector<1x6x32xf32>
    %120 = vector.shape_cast %119 : vector<1x6x32xf32> to vector<6x32xf32>
    %c0_58 = arith.constant 0 : index
    %c128_59 = arith.constant 128 : index
    %121 = vector.load %arg5[%c0_58, %c128_59] : memref<6x160xf32, #tpu.memory_space<vmem>>, vector<6x32xf32>
    tpu.vector_store %arg5[%c0_58, %c128_59], %120 {strides = array<i32>} : memref<6x160xf32, #tpu.memory_space<vmem>>, vector<6x32xf32>,
    %c0_60 = arith.constant 0 : index
    %c0_61 = arith.constant 0 : index
    %122 = vector.load %arg5[%c0_60, %c0_61] : memref<6x160xf32, #tpu.memory_space<vmem>>, vector<6x160xf32>
    %cst_62 = arith.constant dense<0.000000e+00> : vector<6x512xf32>
    %123 = tpu.matmul %122, %0, %cst_62 {dimension_numbers = #tpu.dot_dimension_numbers<[1], [0], [0], [1], [0, 0, 1, 1], [], []>} : vector<6x160xf32>, vector<160x512xf32>, vector<6x512xf32> -> vector<6x512xf32>
    %124 = vector.broadcast %1 : vector<1x512xf32> to vector<6x512xf32>
    %125 = arith.addf %123, %124 : vector<6x512xf32>
    %126 = vector.extract_strided_slice %125 {offsets = [0, 0], sizes = [6, 128], strides = [1, 1]} : vector<6x512xf32> to vector<6x128xf32>
    %127 = arith.negf %126 : vector<6x128xf32>
    %128 = math.exp %127 : vector<6x128xf32>
    %cst_63 = arith.constant 1.000000e+00 : f32
    %129 = vector.broadcast %cst_63 : f32 to vector<6x128xf32>
    %130 = arith.addf %129, %128 : vector<6x128xf32>
    %131 = arith.divf %129, %130 : vector<6x128xf32>
    %132 = vector.extract_strided_slice %125 {offsets = [0, 128], sizes = [6, 128], strides = [1, 1]} : vector<6x512xf32> to vector<6x128xf32>
    %133 = arith.negf %132 : vector<6x128xf32>
    %134 = math.exp %133 : vector<6x128xf32>
    %cst_64 = arith.constant 1.000000e+00 : f32
    %135 = vector.broadcast %cst_64 : f32 to vector<6x128xf32>
    %136 = arith.addf %135, %134 : vector<6x128xf32>
    %137 = arith.divf %135, %136 : vector<6x128xf32>
    %138 = vector.extract_strided_slice %125 {offsets = [0, 256], sizes = [6, 128], strides = [1, 1]} : vector<6x512xf32> to vector<6x128xf32>
    %139 = math.tanh %138 : vector<6x128xf32>
    %140 = vector.extract_strided_slice %125 {offsets = [0, 384], sizes = [6, 128], strides = [1, 1]} : vector<6x512xf32> to vector<6x128xf32>
    %141 = arith.negf %140 : vector<6x128xf32>
    %142 = math.exp %141 : vector<6x128xf32>
    %cst_65 = arith.constant 1.000000e+00 : f32
    %143 = vector.broadcast %cst_65 : f32 to vector<6x128xf32>
    %144 = arith.addf %143, %142 : vector<6x128xf32>
    %145 = arith.divf %143, %144 : vector<6x128xf32>
    %146 = arith.mulf %137, %111 : vector<6x128xf32>
    %147 = arith.mulf %131, %139 : vector<6x128xf32>
    %148 = arith.addf %146, %147 : vector<6x128xf32>
    %149 = math.tanh %148 : vector<6x128xf32>
    %150 = arith.mulf %145, %149 : vector<6x128xf32>
    %c0_66 = arith.constant 0 : index
    %c0_67 = arith.constant 0 : index
    %151 = vector.load %arg4[%c0_66, %c0_67] : memref<6x128xf32, #tpu.memory_space<vmem>>, vector<6x128xf32>
    %152 = arith.addf %151, %150 : vector<6x128xf32>
    %c0_68 = arith.constant 0 : index
    %c0_69 = arith.constant 0 : index
    %153 = vector.load %arg4[%c0_68, %c0_69] : memref<6x128xf32, #tpu.memory_space<vmem>>, vector<6x128xf32>
    tpu.vector_store %arg4[%c0_68, %c0_69], %152 {strides = array<i32>} : memref<6x128xf32, #tpu.memory_space<vmem>>, vector<6x128xf32>,
    %c0_70 = arith.constant 0 : index
    %c0_71 = arith.constant 0 : index
    %154 = vector.load %arg5[%c0_70, %c0_71] : memref<6x160xf32, #tpu.memory_space<vmem>>, vector<6x128xf32>
    tpu.vector_store %arg5[%c0_70, %c0_71], %150 {strides = array<i32>} : memref<6x160xf32, #tpu.memory_space<vmem>>, vector<6x128xf32>,
    %c4_i32 = arith.constant 4 : i32
    %155 = arith.index_cast %c4_i32 : i32 to index
    %c0_72 = arith.constant 0 : index
    %c0_73 = arith.constant 0 : index
    %156 = vector.load %arg1[%155, %c0_72, %c0_73] : memref<8x6x32xf32, #tpu.memory_space<vmem>>, vector<1x6x32xf32>
    %157 = vector.shape_cast %156 : vector<1x6x32xf32> to vector<6x32xf32>
    %c0_74 = arith.constant 0 : index
    %c128_75 = arith.constant 128 : index
    %158 = vector.load %arg5[%c0_74, %c128_75] : memref<6x160xf32, #tpu.memory_space<vmem>>, vector<6x32xf32>
    tpu.vector_store %arg5[%c0_74, %c128_75], %157 {strides = array<i32>} : memref<6x160xf32, #tpu.memory_space<vmem>>, vector<6x32xf32>,
    %c0_76 = arith.constant 0 : index
    %c0_77 = arith.constant 0 : index
    %159 = vector.load %arg5[%c0_76, %c0_77] : memref<6x160xf32, #tpu.memory_space<vmem>>, vector<6x160xf32>
    %cst_78 = arith.constant dense<0.000000e+00> : vector<6x512xf32>
    %160 = tpu.matmul %159, %0, %cst_78 {dimension_numbers = #tpu.dot_dimension_numbers<[1], [0], [0], [1], [0, 0, 1, 1], [], []>} : vector<6x160xf32>, vector<160x512xf32>, vector<6x512xf32> -> vector<6x512xf32>
    %161 = vector.broadcast %1 : vector<1x512xf32> to vector<6x512xf32>
    %162 = arith.addf %160, %161 : vector<6x512xf32>
    %163 = vector.extract_strided_slice %162 {offsets = [0, 0], sizes = [6, 128], strides = [1, 1]} : vector<6x512xf32> to vector<6x128xf32>
    %164 = arith.negf %163 : vector<6x128xf32>
    %165 = math.exp %164 : vector<6x128xf32>
    %cst_79 = arith.constant 1.000000e+00 : f32
    %166 = vector.broadcast %cst_79 : f32 to vector<6x128xf32>
    %167 = arith.addf %166, %165 : vector<6x128xf32>
    %168 = arith.divf %166, %167 : vector<6x128xf32>
    %169 = vector.extract_strided_slice %162 {offsets = [0, 128], sizes = [6, 128], strides = [1, 1]} : vector<6x512xf32> to vector<6x128xf32>
    %170 = arith.negf %169 : vector<6x128xf32>
    %171 = math.exp %170 : vector<6x128xf32>
    %cst_80 = arith.constant 1.000000e+00 : f32
    %172 = vector.broadcast %cst_80 : f32 to vector<6x128xf32>
    %173 = arith.addf %172, %171 : vector<6x128xf32>
    %174 = arith.divf %172, %173 : vector<6x128xf32>
    %175 = vector.extract_strided_slice %162 {offsets = [0, 256], sizes = [6, 128], strides = [1, 1]} : vector<6x512xf32> to vector<6x128xf32>
    %176 = math.tanh %175 : vector<6x128xf32>
    %177 = vector.extract_strided_slice %162 {offsets = [0, 384], sizes = [6, 128], strides = [1, 1]} : vector<6x512xf32> to vector<6x128xf32>
    %178 = arith.negf %177 : vector<6x128xf32>
    %179 = math.exp %178 : vector<6x128xf32>
    %cst_81 = arith.constant 1.000000e+00 : f32
    %180 = vector.broadcast %cst_81 : f32 to vector<6x128xf32>
    %181 = arith.addf %180, %179 : vector<6x128xf32>
    %182 = arith.divf %180, %181 : vector<6x128xf32>
    %183 = arith.mulf %174, %148 : vector<6x128xf32>
    %184 = arith.mulf %168, %176 : vector<6x128xf32>
    %185 = arith.addf %183, %184 : vector<6x128xf32>
    %186 = math.tanh %185 : vector<6x128xf32>
    %187 = arith.mulf %182, %186 : vector<6x128xf32>
    %c0_82 = arith.constant 0 : index
    %c0_83 = arith.constant 0 : index
    %188 = vector.load %arg4[%c0_82, %c0_83] : memref<6x128xf32, #tpu.memory_space<vmem>>, vector<6x128xf32>
    %189 = arith.addf %188, %187 : vector<6x128xf32>
    %c0_84 = arith.constant 0 : index
    %c0_85 = arith.constant 0 : index
    %190 = vector.load %arg4[%c0_84, %c0_85] : memref<6x128xf32, #tpu.memory_space<vmem>>, vector<6x128xf32>
    tpu.vector_store %arg4[%c0_84, %c0_85], %189 {strides = array<i32>} : memref<6x128xf32, #tpu.memory_space<vmem>>, vector<6x128xf32>,
    %c0_86 = arith.constant 0 : index
    %c0_87 = arith.constant 0 : index
    %191 = vector.load %arg5[%c0_86, %c0_87] : memref<6x160xf32, #tpu.memory_space<vmem>>, vector<6x128xf32>
    tpu.vector_store %arg5[%c0_86, %c0_87], %187 {strides = array<i32>} : memref<6x160xf32, #tpu.memory_space<vmem>>, vector<6x128xf32>,
    %c5_i32 = arith.constant 5 : i32
    %192 = arith.index_cast %c5_i32 : i32 to index
    %c0_88 = arith.constant 0 : index
    %c0_89 = arith.constant 0 : index
    %193 = vector.load %arg1[%192, %c0_88, %c0_89] : memref<8x6x32xf32, #tpu.memory_space<vmem>>, vector<1x6x32xf32>
    %194 = vector.shape_cast %193 : vector<1x6x32xf32> to vector<6x32xf32>
    %c0_90 = arith.constant 0 : index
    %c128_91 = arith.constant 128 : index
    %195 = vector.load %arg5[%c0_90, %c128_91] : memref<6x160xf32, #tpu.memory_space<vmem>>, vector<6x32xf32>
    tpu.vector_store %arg5[%c0_90, %c128_91], %194 {strides = array<i32>} : memref<6x160xf32, #tpu.memory_space<vmem>>, vector<6x32xf32>,
    %c0_92 = arith.constant 0 : index
    %c0_93 = arith.constant 0 : index
    %196 = vector.load %arg5[%c0_92, %c0_93] : memref<6x160xf32, #tpu.memory_space<vmem>>, vector<6x160xf32>
    %cst_94 = arith.constant dense<0.000000e+00> : vector<6x512xf32>
    %197 = tpu.matmul %196, %0, %cst_94 {dimension_numbers = #tpu.dot_dimension_numbers<[1], [0], [0], [1], [0, 0, 1, 1], [], []>} : vector<6x160xf32>, vector<160x512xf32>, vector<6x512xf32> -> vector<6x512xf32>
    %198 = vector.broadcast %1 : vector<1x512xf32> to vector<6x512xf32>
    %199 = arith.addf %197, %198 : vector<6x512xf32>
    %200 = vector.extract_strided_slice %199 {offsets = [0, 0], sizes = [6, 128], strides = [1, 1]} : vector<6x512xf32> to vector<6x128xf32>
    %201 = arith.negf %200 : vector<6x128xf32>
    %202 = math.exp %201 : vector<6x128xf32>
    %cst_95 = arith.constant 1.000000e+00 : f32
    %203 = vector.broadcast %cst_95 : f32 to vector<6x128xf32>
    %204 = arith.addf %203, %202 : vector<6x128xf32>
    %205 = arith.divf %203, %204 : vector<6x128xf32>
    %206 = vector.extract_strided_slice %199 {offsets = [0, 128], sizes = [6, 128], strides = [1, 1]} : vector<6x512xf32> to vector<6x128xf32>
    %207 = arith.negf %206 : vector<6x128xf32>
    %208 = math.exp %207 : vector<6x128xf32>
    %cst_96 = arith.constant 1.000000e+00 : f32
    %209 = vector.broadcast %cst_96 : f32 to vector<6x128xf32>
    %210 = arith.addf %209, %208 : vector<6x128xf32>
    %211 = arith.divf %209, %210 : vector<6x128xf32>
    %212 = vector.extract_strided_slice %199 {offsets = [0, 256], sizes = [6, 128], strides = [1, 1]} : vector<6x512xf32> to vector<6x128xf32>
    %213 = math.tanh %212 : vector<6x128xf32>
    %214 = vector.extract_strided_slice %199 {offsets = [0, 384], sizes = [6, 128], strides = [1, 1]} : vector<6x512xf32> to vector<6x128xf32>
    %215 = arith.negf %214 : vector<6x128xf32>
    %216 = math.exp %215 : vector<6x128xf32>
    %cst_97 = arith.constant 1.000000e+00 : f32
    %217 = vector.broadcast %cst_97 : f32 to vector<6x128xf32>
    %218 = arith.addf %217, %216 : vector<6x128xf32>
    %219 = arith.divf %217, %218 : vector<6x128xf32>
    %220 = arith.mulf %211, %185 : vector<6x128xf32>
    %221 = arith.mulf %205, %213 : vector<6x128xf32>
    %222 = arith.addf %220, %221 : vector<6x128xf32>
    %223 = math.tanh %222 : vector<6x128xf32>
    %224 = arith.mulf %219, %223 : vector<6x128xf32>
    %c0_98 = arith.constant 0 : index
    %c0_99 = arith.constant 0 : index
    %225 = vector.load %arg4[%c0_98, %c0_99] : memref<6x128xf32, #tpu.memory_space<vmem>>, vector<6x128xf32>
    %226 = arith.addf %225, %224 : vector<6x128xf32>
    %c0_100 = arith.constant 0 : index
    %c0_101 = arith.constant 0 : index
    %227 = vector.load %arg4[%c0_100, %c0_101] : memref<6x128xf32, #tpu.memory_space<vmem>>, vector<6x128xf32>
    tpu.vector_store %arg4[%c0_100, %c0_101], %226 {strides = array<i32>} : memref<6x128xf32, #tpu.memory_space<vmem>>, vector<6x128xf32>,
    %c0_102 = arith.constant 0 : index
    %c0_103 = arith.constant 0 : index
    %228 = vector.load %arg5[%c0_102, %c0_103] : memref<6x160xf32, #tpu.memory_space<vmem>>, vector<6x128xf32>
    tpu.vector_store %arg5[%c0_102, %c0_103], %224 {strides = array<i32>} : memref<6x160xf32, #tpu.memory_space<vmem>>, vector<6x128xf32>,
    %c6_i32 = arith.constant 6 : i32
    %229 = arith.index_cast %c6_i32 : i32 to index
    %c0_104 = arith.constant 0 : index
    %c0_105 = arith.constant 0 : index
    %230 = vector.load %arg1[%229, %c0_104, %c0_105] : memref<8x6x32xf32, #tpu.memory_space<vmem>>, vector<1x6x32xf32>
    %231 = vector.shape_cast %230 : vector<1x6x32xf32> to vector<6x32xf32>
    %c0_106 = arith.constant 0 : index
    %c128_107 = arith.constant 128 : index
    %232 = vector.load %arg5[%c0_106, %c128_107] : memref<6x160xf32, #tpu.memory_space<vmem>>, vector<6x32xf32>
    tpu.vector_store %arg5[%c0_106, %c128_107], %231 {strides = array<i32>} : memref<6x160xf32, #tpu.memory_space<vmem>>, vector<6x32xf32>,
    %c0_108 = arith.constant 0 : index
    %c0_109 = arith.constant 0 : index
    %233 = vector.load %arg5[%c0_108, %c0_109] : memref<6x160xf32, #tpu.memory_space<vmem>>, vector<6x160xf32>
    %cst_110 = arith.constant dense<0.000000e+00> : vector<6x512xf32>
    %234 = tpu.matmul %233, %0, %cst_110 {dimension_numbers = #tpu.dot_dimension_numbers<[1], [0], [0], [1], [0, 0, 1, 1], [], []>} : vector<6x160xf32>, vector<160x512xf32>, vector<6x512xf32> -> vector<6x512xf32>
    %235 = vector.broadcast %1 : vector<1x512xf32> to vector<6x512xf32>
    %236 = arith.addf %234, %235 : vector<6x512xf32>
    %237 = vector.extract_strided_slice %236 {offsets = [0, 0], sizes = [6, 128], strides = [1, 1]} : vector<6x512xf32> to vector<6x128xf32>
    %238 = arith.negf %237 : vector<6x128xf32>
    %239 = math.exp %238 : vector<6x128xf32>
    %cst_111 = arith.constant 1.000000e+00 : f32
    %240 = vector.broadcast %cst_111 : f32 to vector<6x128xf32>
    %241 = arith.addf %240, %239 : vector<6x128xf32>
    %242 = arith.divf %240, %241 : vector<6x128xf32>
    %243 = vector.extract_strided_slice %236 {offsets = [0, 128], sizes = [6, 128], strides = [1, 1]} : vector<6x512xf32> to vector<6x128xf32>
    %244 = arith.negf %243 : vector<6x128xf32>
    %245 = math.exp %244 : vector<6x128xf32>
    %cst_112 = arith.constant 1.000000e+00 : f32
    %246 = vector.broadcast %cst_112 : f32 to vector<6x128xf32>
    %247 = arith.addf %246, %245 : vector<6x128xf32>
    %248 = arith.divf %246, %247 : vector<6x128xf32>
    %249 = vector.extract_strided_slice %236 {offsets = [0, 256], sizes = [6, 128], strides = [1, 1]} : vector<6x512xf32> to vector<6x128xf32>
    %250 = math.tanh %249 : vector<6x128xf32>
    %251 = vector.extract_strided_slice %236 {offsets = [0, 384], sizes = [6, 128], strides = [1, 1]} : vector<6x512xf32> to vector<6x128xf32>
    %252 = arith.negf %251 : vector<6x128xf32>
    %253 = math.exp %252 : vector<6x128xf32>
    %cst_113 = arith.constant 1.000000e+00 : f32
    %254 = vector.broadcast %cst_113 : f32 to vector<6x128xf32>
    %255 = arith.addf %254, %253 : vector<6x128xf32>
    %256 = arith.divf %254, %255 : vector<6x128xf32>
    %257 = arith.mulf %248, %222 : vector<6x128xf32>
    %258 = arith.mulf %242, %250 : vector<6x128xf32>
    %259 = arith.addf %257, %258 : vector<6x128xf32>
    %260 = math.tanh %259 : vector<6x128xf32>
    %261 = arith.mulf %256, %260 : vector<6x128xf32>
    %c0_114 = arith.constant 0 : index
    %c0_115 = arith.constant 0 : index
    %262 = vector.load %arg4[%c0_114, %c0_115] : memref<6x128xf32, #tpu.memory_space<vmem>>, vector<6x128xf32>
    %263 = arith.addf %262, %261 : vector<6x128xf32>
    %c0_116 = arith.constant 0 : index
    %c0_117 = arith.constant 0 : index
    %264 = vector.load %arg4[%c0_116, %c0_117] : memref<6x128xf32, #tpu.memory_space<vmem>>, vector<6x128xf32>
    tpu.vector_store %arg4[%c0_116, %c0_117], %263 {strides = array<i32>} : memref<6x128xf32, #tpu.memory_space<vmem>>, vector<6x128xf32>,
    %c0_118 = arith.constant 0 : index
    %c0_119 = arith.constant 0 : index
    %265 = vector.load %arg5[%c0_118, %c0_119] : memref<6x160xf32, #tpu.memory_space<vmem>>, vector<6x128xf32>
    tpu.vector_store %arg5[%c0_118, %c0_119], %261 {strides = array<i32>} : memref<6x160xf32, #tpu.memory_space<vmem>>, vector<6x128xf32>,
    %c7_i32 = arith.constant 7 : i32
    %266 = arith.index_cast %c7_i32 : i32 to index
    %c0_120 = arith.constant 0 : index
    %c0_121 = arith.constant 0 : index
    %267 = vector.load %arg1[%266, %c0_120, %c0_121] : memref<8x6x32xf32, #tpu.memory_space<vmem>>, vector<1x6x32xf32>
    %268 = vector.shape_cast %267 : vector<1x6x32xf32> to vector<6x32xf32>
    %c0_122 = arith.constant 0 : index
    %c128_123 = arith.constant 128 : index
    %269 = vector.load %arg5[%c0_122, %c128_123] : memref<6x160xf32, #tpu.memory_space<vmem>>, vector<6x32xf32>
    tpu.vector_store %arg5[%c0_122, %c128_123], %268 {strides = array<i32>} : memref<6x160xf32, #tpu.memory_space<vmem>>, vector<6x32xf32>,
    %c0_124 = arith.constant 0 : index
    %c0_125 = arith.constant 0 : index
    %270 = vector.load %arg5[%c0_124, %c0_125] : memref<6x160xf32, #tpu.memory_space<vmem>>, vector<6x160xf32>
    %cst_126 = arith.constant dense<0.000000e+00> : vector<6x512xf32>
    %271 = tpu.matmul %270, %0, %cst_126 {dimension_numbers = #tpu.dot_dimension_numbers<[1], [0], [0], [1], [0, 0, 1, 1], [], []>} : vector<6x160xf32>, vector<160x512xf32>, vector<6x512xf32> -> vector<6x512xf32>
    %272 = vector.broadcast %1 : vector<1x512xf32> to vector<6x512xf32>
    %273 = arith.addf %271, %272 : vector<6x512xf32>
    %274 = vector.extract_strided_slice %273 {offsets = [0, 0], sizes = [6, 128], strides = [1, 1]} : vector<6x512xf32> to vector<6x128xf32>
    %275 = arith.negf %274 : vector<6x128xf32>
    %276 = math.exp %275 : vector<6x128xf32>
    %cst_127 = arith.constant 1.000000e+00 : f32
    %277 = vector.broadcast %cst_127 : f32 to vector<6x128xf32>
    %278 = arith.addf %277, %276 : vector<6x128xf32>
    %279 = arith.divf %277, %278 : vector<6x128xf32>
    %280 = vector.extract_strided_slice %273 {offsets = [0, 128], sizes = [6, 128], strides = [1, 1]} : vector<6x512xf32> to vector<6x128xf32>
    %281 = arith.negf %280 : vector<6x128xf32>
    %282 = math.exp %281 : vector<6x128xf32>
    %cst_128 = arith.constant 1.000000e+00 : f32
    %283 = vector.broadcast %cst_128 : f32 to vector<6x128xf32>
    %284 = arith.addf %283, %282 : vector<6x128xf32>
    %285 = arith.divf %283, %284 : vector<6x128xf32>
    %286 = vector.extract_strided_slice %273 {offsets = [0, 256], sizes = [6, 128], strides = [1, 1]} : vector<6x512xf32> to vector<6x128xf32>
    %287 = math.tanh %286 : vector<6x128xf32>
    %288 = vector.extract_strided_slice %273 {offsets = [0, 384], sizes = [6, 128], strides = [1, 1]} : vector<6x512xf32> to vector<6x128xf32>
    %289 = arith.negf %288 : vector<6x128xf32>
    %290 = math.exp %289 : vector<6x128xf32>
    %cst_129 = arith.constant 1.000000e+00 : f32
    %291 = vector.broadcast %cst_129 : f32 to vector<6x128xf32>
    %292 = arith.addf %291, %290 : vector<6x128xf32>
    %293 = arith.divf %291, %292 : vector<6x128xf32>
    %294 = arith.mulf %285, %259 : vector<6x128xf32>
    %295 = arith.mulf %279, %287 : vector<6x128xf32>
    %296 = arith.addf %294, %295 : vector<6x128xf32>
    %297 = math.tanh %296 : vector<6x128xf32>
    %298 = arith.mulf %293, %297 : vector<6x128xf32>
    %c0_130 = arith.constant 0 : index
    %c0_131 = arith.constant 0 : index
    %299 = vector.load %arg4[%c0_130, %c0_131] : memref<6x128xf32, #tpu.memory_space<vmem>>, vector<6x128xf32>
    %300 = arith.addf %299, %298 : vector<6x128xf32>
    %c0_132 = arith.constant 0 : index
    %c0_133 = arith.constant 0 : index
    %301 = vector.load %arg4[%c0_132, %c0_133] : memref<6x128xf32, #tpu.memory_space<vmem>>, vector<6x128xf32>
    tpu.vector_store %arg4[%c0_132, %c0_133], %300 {strides = array<i32>} : memref<6x128xf32, #tpu.memory_space<vmem>>, vector<6x128xf32>,
    %c0_134 = arith.constant 0 : index
    %c0_135 = arith.constant 0 : index
    %302 = vector.load %arg5[%c0_134, %c0_135] : memref<6x160xf32, #tpu.memory_space<vmem>>, vector<6x128xf32>
    tpu.vector_store %arg5[%c0_134, %c0_135], %298 {strides = array<i32>} : memref<6x160xf32, #tpu.memory_space<vmem>>, vector<6x128xf32>,
    %c8_i32 = arith.constant 8 : i32
    return
  }
  func.func @transform_0(%arg0: i32) -> (i32, i32, i32) {
    %c0_i32 = arith.constant 0 : i32
    %c0_i32_0 = arith.constant 0 : i32
    %c0_i32_1 = arith.constant 0 : i32
    return %c0_i32, %arg0, %c0_i32_0 : i32, i32, i32
  }
  func.func @transform_1(%arg0: i32) -> (i32, i32) {
    %c0_i32 = arith.constant 0 : i32
    %c0_i32_0 = arith.constant 0 : i32
    %c0_i32_1 = arith.constant 0 : i32
    return %c0_i32, %c0_i32_0 : i32, i32
  }
  func.func @transform_2(%arg0: i32) -> (i32, i32) {
    %c0_i32 = arith.constant 0 : i32
    %c0_i32_0 = arith.constant 0 : i32
    %c0_i32_1 = arith.constant 0 : i32
    return %c0_i32, %c0_i32_0 : i32, i32
  }
  func.func @transform_3(%arg0: i32) -> (i32, i32) {
    %c0_i32 = arith.constant 0 : i32
    %c0_i32_0 = arith.constant 0 : i32
    return %arg0, %c0_i32 : i32, i32
  }
}

</mosaic_0001>

<bundles_post_ra>
// kernel: tpu_custom_call.1
= control target key start
LH: loop header
LB: loop body
LE: loop exit
PB: predicated region body
PF: predicated region fallthrough
CT: control target
= control target key end

     0   :  { %8 = vsyncpa [#allocation4], 0  ;;  %s3007_s0 = inlined_call_operand.vmem [shape: f32[8,6,32], index: 0, kind: input, shape index: {}]   ;;  %s3008_s1 = inlined_call_operand.hbm [shape: f32[160,512], index: 1, kind: input, shape index: {}]   ;;  %s3009_s2 = inlined_call_operand.vmem [shape: f32[1,512], index: 2, kind: input, shape index: {}]   ;;  %s3010_s3 = inlined_call_operand.hbm [shape: f32[6,128], index: 3, kind: output, shape index: {}]  }
   0x1   :  { %9 = vsyncpa [#allocation5], 0  ;;  %s2442_s12 = smov [#allocation3]   ;;  %s2394_s16 = scalar_lea.hbm %s3008_s1, 10240 }
   0x2   :  { %s17_s13 = sshll.u32 %s2442_s12, 4  ;;  %p2395_p0 = scmp.ne.s32.totalorder %s3008_s1, %s2394_s16  ;;  %s18_s13 = int_to_ptr.vmem [resolvable:$true] %s17_s13 }
   0x3   :  { %p2398_p1 = scmp.lt.u32.totalorder %s2394_s16, %s3008_s1 }
   0x5   :  { %p2400_p2 = pnand %p2398_p1, %p2395_p0 }
   0x7   :  { %2403 = shalt.err (!%p2400_p2)
}
   0x8   :  { %s2404_s21 = scalar_lea.vmem %s18_s13, 10240  ;;  %p2409_p4 = scmp.lt.s32.totalorder %s18_s13, %s18_s13 }
   0x9   :  { %p2405_p3 = scmp.ne.s32.totalorder %s18_s13, %s2404_s21  ;;  %p2410_p5 = scmp.lt.s32.totalorder %s2404_s21, %s2404_s21 }
   0xb   :  { %p2411_p6 = por %p2410_p5, %p2409_p4 }
   0xd   :  { %p2412_p7 = pnand %p2411_p6, %p2405_p3 }
   0xf   :  { %2415 = shalt.err (!%p2412_p7)
}
  0x10   :  { %s2443_s22 = smov 512   ;;  %s2444_s23 = smov 32  }
  0x11   :  { %23 = dma.hbm_to_vmem [thread:$0]  %s3008_s1, 10240, %s18_s13, [#allocation4], %s2443_s22, %s2443_s22, %s2444_s23  }
  0x12   :  { %2438 = dma.done.wait [#allocation4], 10240  }
  0x13   :  { %2439 = vsyncadd [#allocation4], 4294957056  ;;  %vm111_vm0 = vcmask 259072   ;;  %v2445_v0 = vmov 0.0   ;;  %v30_v1 = vld [vmem:[#allocation3 + $0x8] sm:$0xff]  ;;  %v29_v3 = vld [vmem:[#allocation3] sm:$0xff] }
  0x14   :  { %110 = vst [vmem:[#allocation2] sm:$0x3f] %v2445_v0  ;;  %112 = vst.msk [vmem:[#allocation2 + $0x8] sm:$0x3f] %vm111_vm0, %v2445_v0  ;;  %v34_v2 = vld [vmem:[#allocation3 + $0x28] sm:$0xff]  ;;  %v33_v5 = vld [vmem:[#allocation3 + $0x20] sm:$0xff] }
  0x15   :  { %113 = vst [vmem:[#allocation6] sm:$0x3f] %v2445_v0  ;;  %v2480_v4 = vpack.c.bf16 %v34_v2, %v30_v1  ;;  %v38_v6 = vld [vmem:[#allocation3 + $0x48] sm:$0xff]  ;;  %v2482_v8 = vpack.c.bf16 %v33_v5, %v29_v3  ;;  %v37_v10 = vld [vmem:[#allocation3 + $0x40] sm:$0xff]  ;;  %v32_v19 = vld [vmem:[#allocation3 + $0x18] sm:$0xff]  ;;  %vm139_vm1 = vcmask 261120  }
  0x16   :  { %v42_v7 = vld [vmem:[#allocation3 + $0x68] sm:$0xff]  ;;  %v41_v11 = vld [vmem:[#allocation3 + $0x60] sm:$0xff]  ;;  %v36_v20 = vld [vmem:[#allocation3 + $0x38] sm:$0xff] }
  0x17   :  { %v2484_v9 = vpack.c.bf16 %v42_v7, %v38_v6  ;;  %v46_v12 = vld [vmem:[#allocation3 + $0x88] sm:$0xff]  ;;  %1622 = vmatprep.subr.bf16.mxu0 %v2480_v4  ;;  %v2488_v14 = vpack.c.bf16 %v41_v11, %v37_v10  ;;  %v45_v15 = vld [vmem:[#allocation3 + $0x80] sm:$0xff]  ;;  %v2493_v22 = vpack.c.bf16 %v36_v20, %v32_v19  ;;  %v31_v23 = vld [vmem:[#allocation3 + $0x10] sm:$0xff] }
  0x18   :  { %v50_v13 = vld [vmem:[#allocation3 + $0xa8] sm:$0xff]  ;;  %1624 = vmatpush1.bf16.msra.mxu0 %v2482_v8  ;;  %v49_v16 = vld [vmem:[#allocation3 + $0xa0] sm:$0xff]  ;;  %v35_v24 = vld [vmem:[#allocation3 + $0x30] sm:$0xff] }
  0x19   :  { %1626 = vmatprep.subr.bf16.mxu0 %v2484_v9  ;;  %v2491_v17 = vpack.c.bf16 %v50_v13, %v46_v12  ;;  %v54_v18 = vld [vmem:[#allocation3 + $0xc8] sm:$0xff]  ;;  %v2495_v25 = vpack.c.bf16 %v35_v24, %v31_v23  ;;  %v2498_v26 = vpack.c.bf16 %v49_v16, %v45_v15  ;;  %1662 = vmatprep.subr.bf16.mxu1 %v2493_v22  ;;  %v40_v27 = vld [vmem:[#allocation3 + $0x58] sm:$0xff]  ;;  %v39_v29 = vld [vmem:[#allocation3 + $0x50] sm:$0xff] }
  0x1a   :  { %v58_v21 = vld [vmem:[#allocation3 + $0xe8] sm:$0xff]  ;;  %v44_v28 = vld [vmem:[#allocation3 + $0x78] sm:$0xff]  ;;  %v53_v31 = vld [vmem:[#allocation3 + $0xc0] sm:$0xff] }
  0x1b   :  { %v2502_v30 = vpack.c.bf16 %v58_v21, %v54_v18  ;;  %v57_v32 = vld [vmem:[#allocation3 + $0xe0] sm:$0xff]  ;;  %1664 = vmatpush1.bf16.msra.mxu1 %v2495_v25  ;;  %v2505_v33 = vpack.c.bf16 %v44_v28, %v40_v27  ;;  %v43_v34 = vld [vmem:[#allocation3 + $0x70] sm:$0xff]  ;;  %v62_v35 = vld [vmem:[#allocation3 + $0x108] sm:$0xff] }
  0x1c   :  { %1628 = vmatpush1.bf16.msra.mxu0 %v2488_v14  ;;  %v66_v36 = vld [vmem:[#allocation3 + $0x128] sm:$0xff]  ;;  %v2507_v37 = vpack.c.bf16 %v43_v34, %v39_v29  ;;  %v48_v38 = vld [vmem:[#allocation3 + $0x98] sm:$0xff]  ;;  %v47_v40 = vld [vmem:[#allocation3 + $0x90] sm:$0xff]  ;;  %v2511_v42 = vpack.c.bf16 %v57_v32, %v53_v31 }
  0x1d   :  { %1630 = vmatprep.subr.bf16.mxu0 %v2491_v17  ;;  %1666 = vmatprep.subr.bf16.mxu1 %v2505_v33  ;;  %v52_v39 = vld [vmem:[#allocation3 + $0xb8] sm:$0xff]  ;;  %v51_v41 = vld [vmem:[#allocation3 + $0xb0] sm:$0xff]  ;;  %v61_v43 = vld [vmem:[#allocation3 + $0x100] sm:$0xff]  ;;  %v2516_v46 = vpack.c.bf16 %v66_v36, %v62_v35 }
  0x1e   :  { %v65_v44 = vld [vmem:[#allocation3 + $0x120] sm:$0xff]  ;;  %v2513_v45 = vpack.c.bf16 %v52_v39, %v48_v38  ;;  %v70_v47 = vld [vmem:[#allocation3 + $0x148] sm:$0xff]  ;;  %v2519_v48 = vpack.c.bf16 %v51_v41, %v47_v40  ;;  %v56_v49 = vld [vmem:[#allocation3 + $0xd8] sm:$0xff] }
  0x1f   :  { %1668 = vmatpush1.bf16.msra.mxu1 %v2507_v37  ;;  %v60_v50 = vld [vmem:[#allocation3 + $0xf8] sm:$0xff]  ;;  %v74_v51 = vld [vmem:[#allocation3 + $0x168] sm:$0xff]  ;;  %v55_v53 = vld [vmem:[#allocation3 + $0xd0] sm:$0xff]  ;;  %v2525_v55 = vpack.c.bf16 %v65_v44, %v61_v43 }
  0x20   :  { %1632 = vmatpush1.bf16.msra.mxu0 %v2498_v26  ;;  %1670 = vmatprep.subr.bf16.mxu1 %v2513_v45  ;;  %v2522_v52 = vpack.c.bf16 %v60_v50, %v56_v49  ;;  %v59_v54 = vld [vmem:[#allocation3 + $0xf0] sm:$0xff]  ;;  %v64_v56 = vld [vmem:[#allocation3 + $0x118] sm:$0xff]  ;;  %v2528_v58 = vpack.c.bf16 %v74_v51, %v70_v47  ;;  %v69_v59 = vld [vmem:[#allocation3 + $0x140] sm:$0xff] }
  0x21   :  { %1634 = vmatprep.subr.bf16.mxu0 %v2502_v30  ;;  %v68_v57 = vld [vmem:[#allocation3 + $0x138] sm:$0xff]  ;;  %v73_v60 = vld [vmem:[#allocation3 + $0x160] sm:$0xff]  ;;  %v78_v61 = vld [vmem:[#allocation3 + $0x188] sm:$0xff]  ;;  %v2531_v62 = vpack.c.bf16 %v59_v54, %v55_v53 }
  0x22   :  { %v82_v63 = vld [vmem:[#allocation3 + $0x1a8] sm:$0xff]  ;;  %v2534_v0 = vpack.c.bf16 %v68_v57, %v64_v56  ;;  %v63_v1 = vld [vmem:[#allocation3 + $0x110] sm:$0xff]  ;;  %v72_v3 = vld [vmem:[#allocation3 + $0x158] sm:$0xff]  ;;  %v2537_v6 = vpack.c.bf16 %v73_v60, %v69_v59 }
  0x23   :  { %1672 = vmatpush1.bf16.msra.mxu1 %v2519_v48  ;;  %v67_v2 = vld [vmem:[#allocation3 + $0x130] sm:$0xff]  ;;  %v76_v5 = vld [vmem:[#allocation3 + $0x178] sm:$0xff]  ;;  %v77_v7 = vld [vmem:[#allocation3 + $0x180] sm:$0xff]  ;;  %v2540_v10 = vpack.c.bf16 %v82_v63, %v78_v61 }
  0x24   :  { %1636 = vmatpush1.bf16.msra.mxu0 %v2511_v42  ;;  %1674 = vmatprep.subr.bf16.mxu1 %v2522_v52  ;;  %v81_v11 = vld [vmem:[#allocation3 + $0x1a0] sm:$0xff]  ;;  %v86_v12 = vld [vmem:[#allocation3 + $0x1c8] sm:$0xff]  ;;  %v2543_v15 = vpack.c.bf16 %v67_v2, %v63_v1  ;;  %v2546_v16 = vpack.c.bf16 %v76_v5, %v72_v3  ;;  %v71_v18 = vld [vmem:[#allocation3 + $0x150] sm:$0xff] }
  0x25   :  { %1638 = vmatprep.subr.bf16.mxu0 %v2516_v46  ;;  %v90_v13 = vld [vmem:[#allocation3 + $0x1e8] sm:$0xff]  ;;  %v75_v19 = vld [vmem:[#allocation3 + $0x170] sm:$0xff]  ;;  %v80_v21 = vld [vmem:[#allocation3 + $0x198] sm:$0xff]  ;;  %v2553_v24 = vpack.c.bf16 %v81_v11, %v77_v7 }
  0x26   :  { %v114_v20 = vld [vmem:[%s3007_s0] sm:$0x3f]  ;;  %v84_v23 = vld [vmem:[#allocation3 + $0x1b8] sm:$0xff]  ;;  %v2556_v27 = vpack.c.bf16 %v90_v13, %v86_v12  ;;  %v85_v28 = vld [vmem:[#allocation3 + $0x1c0] sm:$0xff]  ;;  %v2559_v32 = vpack.c.bf16 %v75_v19, %v71_v18 }
  0x27   :  { %1676 = vmatpush1.bf16.msra.mxu1 %v2531_v62  ;;  %115 = vst.msk [vmem:[#allocation2 + $0x8] sm:$0x3f] %vm111_vm0, %v114_v20  ;;  %v89_v29 = vld [vmem:[#allocation3 + $0x1e0] sm:$0xff]  ;;  %v94_v31 = vld [vmem:[#allocation3 + $0x208] sm:$0xff]  ;;  %v2562_v35 = vpack.c.bf16 %v84_v23, %v80_v21  ;;  %v79_v36 = vld [vmem:[#allocation3 + $0x190] sm:$0xff] }
  0x28   :  { %1640 = vmatpush1.bf16.msra.mxu0 %v2525_v55  ;;  %1678 = vmatprep.subr.bf16.mxu1 %v2534_v0  ;;  %v98_v34 = vld [vmem:[#allocation3 + $0x228] sm:$0xff]  ;;  %v83_v38 = vld [vmem:[#allocation3 + $0x1b0] sm:$0xff]  ;;  %v88_v39 = vld [vmem:[#allocation3 + $0x1d8] sm:$0xff]  ;;  %v2565_v41 = vpack.c.bf16 %v89_v29, %v85_v28 }
  0x29   :  { %1642 = vmatprep.subr.bf16.mxu0 %v2528_v58  ;;  %v92_v40 = vld [vmem:[#allocation3 + $0x1f8] sm:$0xff]  ;;  %v93_v43 = vld [vmem:[#allocation3 + $0x200] sm:$0xff]  ;;  %v2571_v47 = vpack.c.bf16 %v98_v34, %v94_v31  ;;  %v102_v50 = vld [vmem:[#allocation3 + $0x248] sm:$0xff]  ;;  %v2574_v53 = vpack.c.bf16 %v83_v38, %v79_v36  ;;  %v119_v38 = vlaneseq }
  0x2a   :  { %v1579_v44 = vld [vmem:[%s3007_s0 + $0x8] sm:$0x3f]  ;;  %v97_v49 = vld [vmem:[#allocation3 + $0x220] sm:$0xff]  ;;  %v106_v51 = vld [vmem:[#allocation3 + $0x268] sm:$0xff]  ;;  %v2577_v56 = vpack.c.bf16 %v92_v40, %v88_v39 }
  0x2b   :  { %1680 = vmatpush1.bf16.msra.mxu1 %v2543_v15  ;;  %v87_v57 = vld [vmem:[#allocation3 + $0x1d0] sm:$0xff]  ;;  %v96_v60 = vld [vmem:[#allocation3 + $0x218] sm:$0xff]  ;;  %v2583_v63 = vpack.c.bf16 %v97_v49, %v93_v43  ;;  %v2586_v1 = vpack.c.bf16 %v106_v51, %v102_v50  ;;  %v101_v2 = vld [vmem:[#allocation3 + $0x240] sm:$0xff]  ;;  %v120_v39 = vshrl.u32 %v119_v38, 7 }
  0x2c   :  { %1644 = vmatpush1.bf16.msra.mxu0 %v2537_v6  ;;  %1682 = vmatprep.subr.bf16.mxu1 %v2546_v16  ;;  %v91_v59 = vld [vmem:[#allocation3 + $0x1f0] sm:$0xff]  ;;  %v100_v61 = vld [vmem:[#allocation3 + $0x238] sm:$0xff]  ;;  %v105_v3 = vld [vmem:[#allocation3 + $0x260] sm:$0xff] }
  0x2d   :  { %1646 = vmatprep.subr.bf16.mxu0 %v2540_v10  ;;  %v2589_v5 = vpack.c.bf16 %v91_v59, %v87_v57  ;;  %v2592_v7 = vpack.c.bf16 %v100_v61, %v96_v60  ;;  %v95_v11 = vld [vmem:[#allocation3 + $0x210] sm:$0xff]  ;;  %v104_v13 = vld [vmem:[#allocation3 + $0x258] sm:$0xff]  ;;  %v2595_v19 = vpack.c.bf16 %v105_v3, %v101_v2  ;;  %v1585_v36 = vld [vmem:[%s3007_s0 + $0x10] sm:$0x3f]  ;;  %v121_v40 = vsub.s32 0, %v120_v39 }
  0x2e   :  { %v117_v54 = vld [vmem:[#allocation2 + $0x8] sm:$0x3f]  ;;  %v99_v12 = vld [vmem:[#allocation3 + $0x230] sm:$0xff]  ;;  %v133_v51 = vsub.s32 3, %v120_v39 }
  0x2f   :  { %1684 = vmatpush1.bf16.msra.mxu1 %v2559_v32  ;;  %1574 = vmatprep.mubr.msk.f32.mxu0 %vm139_vm1, %v117_v54  ;;  %315 = vst.msk [vmem:[#allocation2 + $0x8] sm:$0x3f] %vm111_vm0, %v1579_v44  ;;  %v108_v18 = vld [vmem:[#allocation3 + $0x278] sm:$0xff]  ;;  %v2599_v20 = vpack.c.bf16 %v99_v12, %v95_v11  ;;  %v103_v23 = vld [vmem:[#allocation3 + $0x250] sm:$0xff]  ;;  %v125_v44 = vsub.s32 1, %v120_v39  ;;  %v129_v11 = vsub.s32 2, %v120_v39 }
  0x30   :  { %1648 = vmatpush1.bf16.msra.mxu0 %v2553_v24  ;;  %1686 = vmatprep.subr.bf16.mxu1 %v2562_v35  ;;  %v2602_v21 = vpack.c.bf16 %v108_v18, %v104_v13  ;;  %v107_v28 = vld [vmem:[#allocation3 + $0x270] sm:$0xff] }
  0x31   :  { %1650 = vmatprep.subr.bf16.mxu0 %v2556_v27  ;;  %1575 = vmatprep.mubr.msk.f32.mxu1 %vm139_vm1, %v117_v54  ;;  %v116_v29 = vld [vmem:[#allocation2] sm:$0x3f]  ;;  %v2606_v31 = vpack.c.bf16 %v107_v28, %v103_v23 }
  0x32   :  { %v109_v43 = vld [vmem:[%s3009_s2] sm:$0xf] }
  0x33   :  { %1688 = vmatpush1.bf16.msra.mxu1 %v2574_v53  ;;  %v2661_v49 = vrot.slane %v109_v43, %v121_v40  ;;  %v2663_v50 = vrot.slane %v109_v43, %v125_v44  ;;  %v2667_v2 = vrot.slane %v109_v43, %v133_v51  ;;  %v2670_v23 = vrot.slane %v109_v43, %v129_v11  ;;  %v309_v11 = vld [vmem:[#allocation6] sm:$0x3f] }
  0x34   :  { %1652 = vmatpush1.bf16.msra.mxu0 %v2565_v41  ;;  %1690 = vmatprep.subr.bf16.mxu1 %v2577_v56 }
  0x35   :  { %1654 = vmatprep.subr.bf16.mxu0 %v2571_v47 }
  0x36   :  { %v317_v34 = vld [vmem:[#allocation2 + $0x8] sm:$0x3f] }
  0x37   :  { %1692 = vmatpush1.bf16.msra.mxu1 %v2589_v5  ;;  %493 = vst.msk [vmem:[#allocation2 + $0x8] sm:$0x3f] %vm111_vm0, %v1585_v36 }
  0x38   :  { %1656 = vmatpush1.bf16.msra.mxu0 %v2583_v63  ;;  %1694 = vmatprep.subr.bf16.mxu1 %v2592_v7 }
  0x39   :  { %1658 = vmatprep.subr.bf16.mxu0 %v2586_v1 }
  0x3b   :  { %1696 = vmatpush1.bf16.msra.mxu1 %v2599_v20 }
  0x3c   :  { %1660 = vmatpush1.bf16.msra.mxu0 %v2595_v19  ;;  %1698 = vmatprep.subr.bf16.mxu1 %v2602_v21 }
  0x3d   :  { %1702 = vmatprep.subr.bf16.mxu0 %v2480_v4 }
  0x3f   :  { %208 = vmatmul.mubr.f32.vlgmr.msra.gmra.mrb[0].mxu0 %v116_v29  ;;  %1700 = vmatpush1.bf16.msra.mxu1 %v2606_v31 }
  0x40   :  { %1704 = vmatpush1.bf16.msra.mxu0 %v2482_v8  ;;  %1742 = vmatprep.subr.bf16.mxu1 %v2493_v22 }
  0x41   :  { %1706 = vmatprep.subr.bf16.mxu0 %v2484_v9  ;;  %1580 = vmatprep.mubr.msk.f32.mxu0 %vm139_vm1, %v317_v34 }
  0x42   :  { %279 = vmatmul.mubr.f32.vlgmr.msra.gmra.mrb[0].mxu1 %v116_v29 }
  0x43   :  { %1744 = vmatpush1.bf16.msra.mxu1 %v2495_v25  ;;  %1581 = vmatprep.mubr.msk.f32.mxu1 %vm139_vm1, %v317_v34 }
  0x44   :  { %1708 = vmatpush1.bf16.msra.mxu0 %v2488_v14  ;;  %1746 = vmatprep.subr.bf16.mxu1 %v2505_v33 }
  0x45   :  { %1710 = vmatprep.subr.bf16.mxu0 %v2491_v17 }
  0x47   :  { %1748 = vmatpush1.bf16.msra.mxu1 %v2507_v37 }
  0x48   :  { %1712 = vmatpush1.bf16.msra.mxu0 %v2498_v26  ;;  %1750 = vmatprep.subr.bf16.mxu1 %v2513_v45 }
  0x49   :  { %1714 = vmatprep.subr.bf16.mxu0 %v2502_v30 }
  0x4b   :  { %1752 = vmatpush1.bf16.msra.mxu1 %v2519_v48 }
  0x4c   :  { %1716 = vmatpush1.bf16.msra.mxu0 %v2511_v42  ;;  %1754 = vmatprep.subr.bf16.mxu1 %v2522_v52 }
  0x4d   :  { %1718 = vmatprep.subr.bf16.mxu0 %v2516_v46 }
  0x4f   :  { %1756 = vmatpush1.bf16.msra.mxu1 %v2531_v62 }
  0x50   :  { %1720 = vmatpush1.bf16.msra.mxu0 %v2525_v55  ;;  %1758 = vmatprep.subr.bf16.mxu1 %v2534_v0 }
  0x51   :  { %1722 = vmatprep.subr.bf16.mxu0 %v2528_v58 }
  0x53   :  { %1760 = vmatpush1.bf16.msra.mxu1 %v2543_v15 }
  0x54   :  { %1724 = vmatpush1.bf16.msra.mxu0 %v2537_v6  ;;  %1762 = vmatprep.subr.bf16.mxu1 %v2546_v16 }
  0x55   :  { %1726 = vmatprep.subr.bf16.mxu0 %v2540_v10 }
  0x57   :  { %1764 = vmatpush1.bf16.msra.mxu1 %v2559_v32 }
  0x58   :  { %1728 = vmatpush1.bf16.msra.mxu0 %v2553_v24  ;;  %1766 = vmatprep.subr.bf16.mxu1 %v2562_v35 }
  0x59   :  { %1730 = vmatprep.subr.bf16.mxu0 %v2556_v27 }
  0x5b   :  { %1768 = vmatpush1.bf16.msra.mxu1 %v2574_v53 }
  0x5c   :  { %1732 = vmatpush1.bf16.msra.mxu0 %v2565_v41  ;;  %1770 = vmatprep.subr.bf16.mxu1 %v2577_v56 }
  0x5d   :  { %1734 = vmatprep.subr.bf16.mxu0 %v2571_v47 }
  0x5f   :  { %1772 = vmatpush1.bf16.msra.mxu1 %v2589_v5 }
  0x60   :  { %1736 = vmatpush1.bf16.msra.mxu0 %v2583_v63  ;;  %1774 = vmatprep.subr.bf16.mxu1 %v2592_v7 }
  0x61   :  { %1738 = vmatprep.subr.bf16.mxu0 %v2586_v1 }
  0x63   :  { %1776 = vmatpush1.bf16.msra.mxu1 %v2599_v20 }
  0x64   :  { %1740 = vmatpush1.bf16.msra.mxu0 %v2595_v19  ;;  %1778 = vmatprep.subr.bf16.mxu1 %v2602_v21 }
  0x65   :  { %1782 = vmatprep.subr.bf16.mxu0 %v2480_v4 }
  0x67   :  { %1780 = vmatpush1.bf16.msra.mxu1 %v2606_v31 }
  0x68   :  { %1822 = vmatprep.subr.bf16.mxu1 %v2493_v22 }
 0x112   :  { %v209_v54 = vpop.f32.mrb[0].mxu0 }
 0x113   :  { %v210_v57 = vadd.f32 %v209_v54, %v2661_v49  ;;  %v211_v59 = vpop.f32.mrb[1].mxu0 }
 0x114   :  { %v212_v60 = vadd.f32 %v211_v59, %v2663_v50 }
 0x115   :  { %v1576_v61 = vmul.f32 -1.442695, %v210_v57  ;;  %v280_v12 = vpop.f32.mrb[0].mxu1 }
 0x116   :  { %v1577_v3 = vmul.f32 -1.442695, %v212_v60  ;;  %v282_v13 = vpop.f32.mrb[1].mxu1  ;;  %v281_v29 = vadd.f32 %v280_v12, %v2670_v23 }
 0x117   :  { %2266 = vpow2.f32 %v1576_v61  ;;  %v283_v18 = vadd.f32 %v282_v13, %v2667_v2 }
 0x118   :  { %2268 = vpow2.f32 %v1577_v3 }
 0x119   :  { %v1578_v28 = vmul.f32 -1.442695, %v283_v18 }
 0x11b   :  { %2270 = vpow2.f32 %v1578_v28  ;;  %v495_v28 = vld [vmem:[#allocation2 + $0x8] sm:$0x3f] }
 0x11c   :  { %2272 = vtanh.f32 %v281_v29  ;;  %v1591_v29 = vld [vmem:[%s3007_s0 + $0x18] sm:$0x3f] }
 0x11d   :  { %671 = vst.msk [vmem:[#allocation2 + $0x8] sm:$0x3f] %vm111_vm0, %v1591_v29 }
 0x121   :  { %v2267_v34 = vpop.eup %2266 }
 0x122   :  { %v2269_v36 = vpop.eup %2268  ;;  %v288_v38 = vadd.f32 1.0, %v2267_v34 }
 0x123   :  { %v294_v40 = vadd.f32 1.0, %v2269_v36 }
 0x124   :  { %2274 = vrcp.f32 %v288_v38 }
 0x125   :  { %2276 = vrcp.f32 %v294_v40  ;;  %v2271_v39 = vpop.eup %2270 }
 0x126   :  { %v2273_v44 = vpop.eup %2272  ;;  %v301_v54 = vadd.f32 1.0, %v2271_v39 }
 0x128   :  { %2278 = vrcp.f32 %v301_v54 }
 0x12e   :  { %v2275_v51 = vpop.eup %2274 }
 0x12f   :  { %v2277_v57 = vpop.eup %2276  ;;  %v305_v59 = vmul.f32 %v2275_v51, %v2273_v44 }
 0x130   :  { %v304_v60 = vmul.f32 0.0, %v2277_v57 }
 0x132   :  { %v2673_v43 = vadd.f32 %v305_v59, %v304_v60  ;;  %v2279_v61 = vpop.eup %2278 }
 0x134   :  { %2280 = vtanh.f32 %v2673_v43 }
 0x13e   :  { %v2281_v3 = vpop.eup %2280 }
 0x13f   :  { %v308_v12 = vmul.f32 %v2281_v3, %v2279_v61 }
 0x141   :  { %v310_v13 = vadd.f32 %v309_v11, %v308_v12  ;;  %312 = vst [vmem:[#allocation2] sm:$0x3f] %v308_v12 }
 0x143   :  { %311 = vst [vmem:[#allocation6] sm:$0x3f] %v310_v13 }
 0x148   :  { %v316_v18 = vld [vmem:[#allocation2] sm:$0x3f] }
 0x149   :  { %386 = vmatmul.mubr.f32.vlgmr.msra.gmra.mrb[2].mxu0 %v316_v18  ;;  %457 = vmatmul.mubr.f32.vlgmr.msra.gmra.mrb[2].mxu1 %v316_v18 }
 0x14a   :  { %1784 = vmatpush1.bf16.msra.mxu0 %v2482_v8  ;;  %1824 = vmatpush1.bf16.msra.mxu1 %v2495_v25 }
 0x14b   :  { %1786 = vmatprep.subr.bf16.mxu0 %v2484_v9  ;;  %1826 = vmatprep.subr.bf16.mxu1 %v2505_v33 }
 0x14c   :  { %1586 = vmatprep.mubr.msk.f32.mxu0 %vm139_vm1, %v495_v28  ;;  %1587 = vmatprep.mubr.msk.f32.mxu1 %vm139_vm1, %v495_v28 }
 0x14e   :  { %1788 = vmatpush1.bf16.msra.mxu0 %v2488_v14  ;;  %1828 = vmatpush1.bf16.msra.mxu1 %v2507_v37 }
 0x14f   :  { %1790 = vmatprep.subr.bf16.mxu0 %v2491_v17  ;;  %1830 = vmatprep.subr.bf16.mxu1 %v2513_v45 }
 0x152   :  { %1792 = vmatpush1.bf16.msra.mxu0 %v2498_v26  ;;  %1832 = vmatpush1.bf16.msra.mxu1 %v2519_v48 }
 0x153   :  { %1794 = vmatprep.subr.bf16.mxu0 %v2502_v30  ;;  %1834 = vmatprep.subr.bf16.mxu1 %v2522_v52 }
 0x156   :  { %1796 = vmatpush1.bf16.msra.mxu0 %v2511_v42  ;;  %1836 = vmatpush1.bf16.msra.mxu1 %v2531_v62 }
 0x157   :  { %1798 = vmatprep.subr.bf16.mxu0 %v2516_v46  ;;  %1838 = vmatprep.subr.bf16.mxu1 %v2534_v0 }
 0x15a   :  { %1800 = vmatpush1.bf16.msra.mxu0 %v2525_v55  ;;  %1840 = vmatpush1.bf16.msra.mxu1 %v2543_v15 }
 0x15b   :  { %1802 = vmatprep.subr.bf16.mxu0 %v2528_v58  ;;  %1842 = vmatprep.subr.bf16.mxu1 %v2546_v16 }
 0x15e   :  { %1804 = vmatpush1.bf16.msra.mxu0 %v2537_v6  ;;  %1844 = vmatpush1.bf16.msra.mxu1 %v2559_v32 }
 0x15f   :  { %1806 = vmatprep.subr.bf16.mxu0 %v2540_v10  ;;  %1846 = vmatprep.subr.bf16.mxu1 %v2562_v35 }
 0x162   :  { %1808 = vmatpush1.bf16.msra.mxu0 %v2553_v24  ;;  %1848 = vmatpush1.bf16.msra.mxu1 %v2574_v53 }
 0x163   :  { %1810 = vmatprep.subr.bf16.mxu0 %v2556_v27  ;;  %1850 = vmatprep.subr.bf16.mxu1 %v2577_v56 }
 0x166   :  { %1812 = vmatpush1.bf16.msra.mxu0 %v2565_v41  ;;  %1852 = vmatpush1.bf16.msra.mxu1 %v2589_v5 }
 0x167   :  { %1814 = vmatprep.subr.bf16.mxu0 %v2571_v47  ;;  %1854 = vmatprep.subr.bf16.mxu1 %v2592_v7 }
 0x16a   :  { %1816 = vmatpush1.bf16.msra.mxu0 %v2583_v63  ;;  %1856 = vmatpush1.bf16.msra.mxu1 %v2599_v20 }
 0x16b   :  { %1818 = vmatprep.subr.bf16.mxu0 %v2586_v1  ;;  %1858 = vmatprep.subr.bf16.mxu1 %v2602_v21 }
 0x16e   :  { %1820 = vmatpush1.bf16.msra.mxu0 %v2595_v19  ;;  %1860 = vmatpush1.bf16.msra.mxu1 %v2606_v31 }
 0x16f   :  { %1862 = vmatprep.subr.bf16.mxu0 %v2480_v4  ;;  %1902 = vmatprep.subr.bf16.mxu1 %v2493_v22 }
 0x21c   :  { %v387_v34 = vpop.f32.mrb[2].mxu0  ;;  %v458_v36 = vpop.f32.mrb[2].mxu1 }
 0x21d   :  { %v388_v38 = vadd.f32 %v387_v34, %v2661_v49  ;;  %v389_v40 = vpop.f32.mrb[3].mxu0  ;;  %v460_v39 = vpop.f32.mrb[3].mxu1  ;;  %v459_v60 = vadd.f32 %v458_v36, %v2670_v23 }
 0x21e   :  { %v390_v44 = vadd.f32 %v389_v40, %v2663_v50  ;;  %v461_v57 = vadd.f32 %v460_v39, %v2667_v2 }
 0x21f   :  { %v1582_v51 = vmul.f32 -1.442695, %v388_v38 }
 0x220   :  { %v1583_v54 = vmul.f32 -1.442695, %v390_v44  ;;  %v1584_v59 = vmul.f32 -1.442695, %v461_v57 }
 0x221   :  { %2282 = vpow2.f32 %v1582_v51 }
 0x222   :  { %2284 = vpow2.f32 %v1583_v54  ;;  %v487_v54 = vld [vmem:[#allocation6] sm:$0x3f] }
 0x223   :  { %2286 = vpow2.f32 %v1584_v59 }
 0x224   :  { %2288 = vtanh.f32 %v459_v60  ;;  %v1597_v60 = vld [vmem:[%s3007_s0 + $0x20] sm:$0x3f] }
 0x22b   :  { %v2283_v61 = vpop.eup %2282 }
 0x22c   :  { %v2285_v3 = vpop.eup %2284  ;;  %v466_v11 = vadd.f32 1.0, %v2283_v61 }
 0x22d   :  { %v472_v12 = vadd.f32 1.0, %v2285_v3  ;;  %v2287_v13 = vpop.eup %2286 }
 0x22e   :  { %2290 = vrcp.f32 %v466_v11  ;;  %v2289_v18 = vpop.eup %2288  ;;  %v479_v38 = vadd.f32 1.0, %v2287_v13 }
 0x22f   :  { %2292 = vrcp.f32 %v472_v12 }
 0x230   :  { %2294 = vrcp.f32 %v479_v38 }
 0x238   :  { %v2291_v28 = vpop.eup %2290 }
 0x239   :  { %v2293_v29 = vpop.eup %2292  ;;  %v483_v34 = vmul.f32 %v2291_v28, %v2289_v18 }
 0x23a   :  { %v482_v40 = vmul.f32 %v2293_v29, %v2673_v43  ;;  %v2295_v36 = vpop.eup %2294  ;;  %v673_v43 = vld [vmem:[#allocation2 + $0x8] sm:$0x3f] }
 0x23b   :  { %849 = vst.msk [vmem:[#allocation2 + $0x8] sm:$0x3f] %vm111_vm0, %v1597_v60 }
 0x23c   :  { %v2727_v39 = vadd.f32 %v483_v34, %v482_v40 }
 0x23e   :  { %2296 = vtanh.f32 %v2727_v39 }
 0x248   :  { %v2297_v44 = vpop.eup %2296 }
 0x249   :  { %v486_v51 = vmul.f32 %v2297_v44, %v2295_v36 }
 0x24b   :  { %v488_v57 = vadd.f32 %v487_v54, %v486_v51  ;;  %490 = vst [vmem:[#allocation2] sm:$0x3f] %v486_v51 }
 0x24d   :  { %489 = vst [vmem:[#allocation6] sm:$0x3f] %v488_v57 }
 0x252   :  { %v494_v59 = vld [vmem:[#allocation2] sm:$0x3f] }
 0x253   :  { %564 = vmatmul.mubr.f32.vlgmr.msra.gmra.mrb[4].mxu0 %v494_v59  ;;  %635 = vmatmul.mubr.f32.vlgmr.msra.gmra.mrb[4].mxu1 %v494_v59 }
 0x254   :  { %1864 = vmatpush1.bf16.msra.mxu0 %v2482_v8  ;;  %1904 = vmatpush1.bf16.msra.mxu1 %v2495_v25 }
 0x255   :  { %1866 = vmatprep.subr.bf16.mxu0 %v2484_v9  ;;  %1906 = vmatprep.subr.bf16.mxu1 %v2505_v33 }
 0x256   :  { %1592 = vmatprep.mubr.msk.f32.mxu0 %vm139_vm1, %v673_v43  ;;  %1593 = vmatprep.mubr.msk.f32.mxu1 %vm139_vm1, %v673_v43 }
 0x258   :  { %1868 = vmatpush1.bf16.msra.mxu0 %v2488_v14  ;;  %1908 = vmatpush1.bf16.msra.mxu1 %v2507_v37 }
 0x259   :  { %1870 = vmatprep.subr.bf16.mxu0 %v2491_v17  ;;  %1910 = vmatprep.subr.bf16.mxu1 %v2513_v45 }
 0x25c   :  { %1872 = vmatpush1.bf16.msra.mxu0 %v2498_v26  ;;  %1912 = vmatpush1.bf16.msra.mxu1 %v2519_v48 }
 0x25d   :  { %1874 = vmatprep.subr.bf16.mxu0 %v2502_v30  ;;  %1914 = vmatprep.subr.bf16.mxu1 %v2522_v52 }
 0x260   :  { %1876 = vmatpush1.bf16.msra.mxu0 %v2511_v42  ;;  %1916 = vmatpush1.bf16.msra.mxu1 %v2531_v62 }
 0x261   :  { %1878 = vmatprep.subr.bf16.mxu0 %v2516_v46  ;;  %1918 = vmatprep.subr.bf16.mxu1 %v2534_v0 }
 0x264   :  { %1880 = vmatpush1.bf16.msra.mxu0 %v2525_v55  ;;  %1920 = vmatpush1.bf16.msra.mxu1 %v2543_v15 }
 0x265   :  { %1882 = vmatprep.subr.bf16.mxu0 %v2528_v58  ;;  %1922 = vmatprep.subr.bf16.mxu1 %v2546_v16 }
 0x268   :  { %1884 = vmatpush1.bf16.msra.mxu0 %v2537_v6  ;;  %1924 = vmatpush1.bf16.msra.mxu1 %v2559_v32 }
 0x269   :  { %1886 = vmatprep.subr.bf16.mxu0 %v2540_v10  ;;  %1926 = vmatprep.subr.bf16.mxu1 %v2562_v35 }
 0x26c   :  { %1888 = vmatpush1.bf16.msra.mxu0 %v2553_v24  ;;  %1928 = vmatpush1.bf16.msra.mxu1 %v2574_v53 }
 0x26d   :  { %1890 = vmatprep.subr.bf16.mxu0 %v2556_v27  ;;  %1930 = vmatprep.subr.bf16.mxu1 %v2577_v56 }
 0x270   :  { %1892 = vmatpush1.bf16.msra.mxu0 %v2565_v41  ;;  %1932 = vmatpush1.bf16.msra.mxu1 %v2589_v5 }
 0x271   :  { %1894 = vmatprep.subr.bf16.mxu0 %v2571_v47  ;;  %1934 = vmatprep.subr.bf16.mxu1 %v2592_v7 }
 0x274   :  { %1896 = vmatpush1.bf16.msra.mxu0 %v2583_v63  ;;  %1936 = vmatpush1.bf16.msra.mxu1 %v2599_v20 }
 0x275   :  { %1898 = vmatprep.subr.bf16.mxu0 %v2586_v1  ;;  %1938 = vmatprep.subr.bf16.mxu1 %v2602_v21 }
 0x278   :  { %1900 = vmatpush1.bf16.msra.mxu0 %v2595_v19  ;;  %1940 = vmatpush1.bf16.msra.mxu1 %v2606_v31 }
 0x279   :  { %1942 = vmatprep.subr.bf16.mxu0 %v2480_v4  ;;  %1982 = vmatprep.subr.bf16.mxu1 %v2493_v22 }
 0x326   :  { %v565_v61 = vpop.f32.mrb[4].mxu0  ;;  %v636_v3 = vpop.f32.mrb[4].mxu1 }
 0x327   :  { %v566_v11 = vadd.f32 %v565_v61, %v2661_v49  ;;  %v567_v12 = vpop.f32.mrb[5].mxu0  ;;  %v638_v13 = vpop.f32.mrb[5].mxu1  ;;  %v637_v40 = vadd.f32 %v636_v3, %v2670_v23 }
 0x328   :  { %v568_v18 = vadd.f32 %v567_v12, %v2663_v50  ;;  %v639_v34 = vadd.f32 %v638_v13, %v2667_v2 }
 0x329   :  { %v1588_v28 = vmul.f32 -1.442695, %v566_v11 }
 0x32a   :  { %v1589_v29 = vmul.f32 -1.442695, %v568_v18  ;;  %v1590_v38 = vmul.f32 -1.442695, %v639_v34 }
 0x32b   :  { %2298 = vpow2.f32 %v1588_v28 }
 0x32c   :  { %2300 = vpow2.f32 %v1589_v29  ;;  %v665_v29 = vld [vmem:[#allocation6] sm:$0x3f] }
 0x32d   :  { %2302 = vpow2.f32 %v1590_v38 }
 0x32e   :  { %2304 = vtanh.f32 %v637_v40  ;;  %v1603_v40 = vld [vmem:[%s3007_s0 + $0x28] sm:$0x3f] }
 0x335   :  { %v2299_v36 = vpop.eup %2298 }
 0x336   :  { %v2301_v44 = vpop.eup %2300  ;;  %v644_v51 = vadd.f32 1.0, %v2299_v36 }
 0x337   :  { %v650_v54 = vadd.f32 1.0, %v2301_v44  ;;  %v2303_v57 = vpop.eup %2302 }
 0x338   :  { %2306 = vrcp.f32 %v644_v51  ;;  %v2305_v59 = vpop.eup %2304  ;;  %v657_v11 = vadd.f32 1.0, %v2303_v57 }
 0x339   :  { %2308 = vrcp.f32 %v650_v54 }
 0x33a   :  { %2310 = vrcp.f32 %v657_v11 }
 0x342   :  { %v2307_v43 = vpop.eup %2306 }
 0x343   :  { %v2309_v60 = vpop.eup %2308  ;;  %v661_v61 = vmul.f32 %v2307_v43, %v2305_v59 }
 0x344   :  { %v660_v12 = vmul.f32 %v2309_v60, %v2727_v39  ;;  %v2311_v3 = vpop.eup %2310  ;;  %v851_v39 = vld [vmem:[#allocation2 + $0x8] sm:$0x3f] }
 0x345   :  { %1027 = vst.msk [vmem:[#allocation2 + $0x8] sm:$0x3f] %vm111_vm0, %v1603_v40 }
 0x346   :  { %v2781_v13 = vadd.f32 %v661_v61, %v660_v12 }
 0x348   :  { %2312 = vtanh.f32 %v2781_v13 }
 0x352   :  { %v2313_v18 = vpop.eup %2312 }
 0x353   :  { %v664_v28 = vmul.f32 %v2313_v18, %v2311_v3 }
 0x355   :  { %v666_v34 = vadd.f32 %v665_v29, %v664_v28  ;;  %668 = vst [vmem:[#allocation2] sm:$0x3f] %v664_v28 }
 0x357   :  { %667 = vst [vmem:[#allocation6] sm:$0x3f] %v666_v34 }
 0x35c   :  { %v672_v38 = vld [vmem:[#allocation2] sm:$0x3f] }
 0x35d   :  { %742 = vmatmul.mubr.f32.vlgmr.msra.gmra.mrb[6].mxu0 %v672_v38  ;;  %813 = vmatmul.mubr.f32.vlgmr.msra.gmra.mrb[6].mxu1 %v672_v38 }
 0x35e   :  { %1944 = vmatpush1.bf16.msra.mxu0 %v2482_v8  ;;  %1984 = vmatpush1.bf16.msra.mxu1 %v2495_v25 }
 0x35f   :  { %1946 = vmatprep.subr.bf16.mxu0 %v2484_v9  ;;  %1986 = vmatprep.subr.bf16.mxu1 %v2505_v33 }
 0x360   :  { %1598 = vmatprep.mubr.msk.f32.mxu0 %vm139_vm1, %v851_v39  ;;  %1599 = vmatprep.mubr.msk.f32.mxu1 %vm139_vm1, %v851_v39 }
 0x362   :  { %1948 = vmatpush1.bf16.msra.mxu0 %v2488_v14  ;;  %1988 = vmatpush1.bf16.msra.mxu1 %v2507_v37 }
 0x363   :  { %1950 = vmatprep.subr.bf16.mxu0 %v2491_v17  ;;  %1990 = vmatprep.subr.bf16.mxu1 %v2513_v45 }
 0x366   :  { %1952 = vmatpush1.bf16.msra.mxu0 %v2498_v26  ;;  %1992 = vmatpush1.bf16.msra.mxu1 %v2519_v48 }
 0x367   :  { %1954 = vmatprep.subr.bf16.mxu0 %v2502_v30  ;;  %1994 = vmatprep.subr.bf16.mxu1 %v2522_v52 }
 0x36a   :  { %1956 = vmatpush1.bf16.msra.mxu0 %v2511_v42  ;;  %1996 = vmatpush1.bf16.msra.mxu1 %v2531_v62 }
 0x36b   :  { %1958 = vmatprep.subr.bf16.mxu0 %v2516_v46  ;;  %1998 = vmatprep.subr.bf16.mxu1 %v2534_v0 }
 0x36e   :  { %1960 = vmatpush1.bf16.msra.mxu0 %v2525_v55  ;;  %2000 = vmatpush1.bf16.msra.mxu1 %v2543_v15 }
 0x36f   :  { %1962 = vmatprep.subr.bf16.mxu0 %v2528_v58  ;;  %2002 = vmatprep.subr.bf16.mxu1 %v2546_v16 }
 0x372   :  { %1964 = vmatpush1.bf16.msra.mxu0 %v2537_v6  ;;  %2004 = vmatpush1.bf16.msra.mxu1 %v2559_v32 }
 0x373   :  { %1966 = vmatprep.subr.bf16.mxu0 %v2540_v10  ;;  %2006 = vmatprep.subr.bf16.mxu1 %v2562_v35 }
 0x376   :  { %1968 = vmatpush1.bf16.msra.mxu0 %v2553_v24  ;;  %2008 = vmatpush1.bf16.msra.mxu1 %v2574_v53 }
 0x377   :  { %1970 = vmatprep.subr.bf16.mxu0 %v2556_v27  ;;  %2010 = vmatprep.subr.bf16.mxu1 %v2577_v56 }
 0x37a   :  { %1972 = vmatpush1.bf16.msra.mxu0 %v2565_v41  ;;  %2012 = vmatpush1.bf16.msra.mxu1 %v2589_v5 }
 0x37b   :  { %1974 = vmatprep.subr.bf16.mxu0 %v2571_v47  ;;  %2014 = vmatprep.subr.bf16.mxu1 %v2592_v7 }
 0x37e   :  { %1976 = vmatpush1.bf16.msra.mxu0 %v2583_v63  ;;  %2016 = vmatpush1.bf16.msra.mxu1 %v2599_v20 }
 0x37f   :  { %1978 = vmatprep.subr.bf16.mxu0 %v2586_v1  ;;  %2018 = vmatprep.subr.bf16.mxu1 %v2602_v21 }
 0x382   :  { %1980 = vmatpush1.bf16.msra.mxu0 %v2595_v19  ;;  %2020 = vmatpush1.bf16.msra.mxu1 %v2606_v31 }
 0x383   :  { %2022 = vmatprep.subr.bf16.mxu0 %v2480_v4  ;;  %2062 = vmatprep.subr.bf16.mxu1 %v2493_v22 }
 0x430   :  { %v743_v36 = vpop.f32.mrb[6].mxu0  ;;  %v814_v44 = vpop.f32.mrb[6].mxu1 }
 0x431   :  { %v744_v51 = vadd.f32 %v743_v36, %v2661_v49  ;;  %v745_v54 = vpop.f32.mrb[7].mxu0  ;;  %v816_v57 = vpop.f32.mrb[7].mxu1  ;;  %v815_v12 = vadd.f32 %v814_v44, %v2670_v23 }
 0x432   :  { %v746_v59 = vadd.f32 %v745_v54, %v2663_v50  ;;  %v817_v61 = vadd.f32 %v816_v57, %v2667_v2 }
 0x433   :  { %v1594_v43 = vmul.f32 -1.442695, %v744_v51 }
 0x434   :  { %v1595_v60 = vmul.f32 -1.442695, %v746_v59  ;;  %v1596_v11 = vmul.f32 -1.442695, %v817_v61 }
 0x435   :  { %2314 = vpow2.f32 %v1594_v43 }
 0x436   :  { %2316 = vpow2.f32 %v1595_v60  ;;  %v843_v60 = vld [vmem:[#allocation6] sm:$0x3f] }
 0x437   :  { %2318 = vpow2.f32 %v1596_v11 }
 0x438   :  { %2320 = vtanh.f32 %v815_v12  ;;  %v1609_v12 = vld [vmem:[%s3007_s0 + $0x30] sm:$0x3f] }
 0x43f   :  { %v2315_v3 = vpop.eup %2314 }
 0x440   :  { %v2317_v18 = vpop.eup %2316  ;;  %v822_v28 = vadd.f32 1.0, %v2315_v3 }
 0x441   :  { %v828_v29 = vadd.f32 1.0, %v2317_v18  ;;  %v2319_v34 = vpop.eup %2318 }
 0x442   :  { %2322 = vrcp.f32 %v822_v28  ;;  %v2321_v38 = vpop.eup %2320  ;;  %v835_v51 = vadd.f32 1.0, %v2319_v34 }
 0x443   :  { %2324 = vrcp.f32 %v828_v29 }
 0x444   :  { %2326 = vrcp.f32 %v835_v51 }
 0x44c   :  { %v2323_v39 = vpop.eup %2322 }
 0x44d   :  { %v2325_v40 = vpop.eup %2324  ;;  %v839_v36 = vmul.f32 %v2323_v39, %v2321_v38 }
 0x44e   :  { %v838_v54 = vmul.f32 %v2325_v40, %v2781_v13  ;;  %v2327_v44 = vpop.eup %2326  ;;  %v1029_v13 = vld [vmem:[#allocation2 + $0x8] sm:$0x3f] }
 0x44f   :  { %1205 = vst.msk [vmem:[#allocation2 + $0x8] sm:$0x3f] %vm111_vm0, %v1609_v12 }
 0x450   :  { %v2835_v57 = vadd.f32 %v839_v36, %v838_v54 }
 0x452   :  { %2328 = vtanh.f32 %v2835_v57 }
 0x45c   :  { %v2329_v59 = vpop.eup %2328 }
 0x45d   :  { %v842_v43 = vmul.f32 %v2329_v59, %v2327_v44 }
 0x45f   :  { %v844_v61 = vadd.f32 %v843_v60, %v842_v43  ;;  %846 = vst [vmem:[#allocation2] sm:$0x3f] %v842_v43 }
 0x461   :  { %845 = vst [vmem:[#allocation6] sm:$0x3f] %v844_v61 }
 0x466   :  { %v850_v11 = vld [vmem:[#allocation2] sm:$0x3f] }
 0x467   :  { %920 = vmatmul.mubr.f32.vlgmr.msra.gmra.mrb[8].mxu0 %v850_v11  ;;  %991 = vmatmul.mubr.f32.vlgmr.msra.gmra.mrb[8].mxu1 %v850_v11 }
 0x468   :  { %2024 = vmatpush1.bf16.msra.mxu0 %v2482_v8  ;;  %2064 = vmatpush1.bf16.msra.mxu1 %v2495_v25 }
 0x469   :  { %2026 = vmatprep.subr.bf16.mxu0 %v2484_v9  ;;  %2066 = vmatprep.subr.bf16.mxu1 %v2505_v33 }
 0x46a   :  { %1604 = vmatprep.mubr.msk.f32.mxu0 %vm139_vm1, %v1029_v13  ;;  %1605 = vmatprep.mubr.msk.f32.mxu1 %vm139_vm1, %v1029_v13 }
 0x46c   :  { %2028 = vmatpush1.bf16.msra.mxu0 %v2488_v14  ;;  %2068 = vmatpush1.bf16.msra.mxu1 %v2507_v37 }
 0x46d   :  { %2030 = vmatprep.subr.bf16.mxu0 %v2491_v17  ;;  %2070 = vmatprep.subr.bf16.mxu1 %v2513_v45 }
 0x470   :  { %2032 = vmatpush1.bf16.msra.mxu0 %v2498_v26  ;;  %2072 = vmatpush1.bf16.msra.mxu1 %v2519_v48 }
 0x471   :  { %2034 = vmatprep.subr.bf16.mxu0 %v2502_v30  ;;  %2074 = vmatprep.subr.bf16.mxu1 %v2522_v52 }
 0x474   :  { %2036 = vmatpush1.bf16.msra.mxu0 %v2511_v42  ;;  %2076 = vmatpush1.bf16.msra.mxu1 %v2531_v62 }
 0x475   :  { %2038 = vmatprep.subr.bf16.mxu0 %v2516_v46  ;;  %2078 = vmatprep.subr.bf16.mxu1 %v2534_v0 }
 0x478   :  { %2040 = vmatpush1.bf16.msra.mxu0 %v2525_v55  ;;  %2080 = vmatpush1.bf16.msra.mxu1 %v2543_v15 }
 0x479   :  { %2042 = vmatprep.subr.bf16.mxu0 %v2528_v58  ;;  %2082 = vmatprep.subr.bf16.mxu1 %v2546_v16 }
 0x47c   :  { %2044 = vmatpush1.bf16.msra.mxu0 %v2537_v6  ;;  %2084 = vmatpush1.bf16.msra.mxu1 %v2559_v32 }
 0x47d   :  { %2046 = vmatprep.subr.bf16.mxu0 %v2540_v10  ;;  %2086 = vmatprep.subr.bf16.mxu1 %v2562_v35 }
 0x480   :  { %2048 = vmatpush1.bf16.msra.mxu0 %v2553_v24  ;;  %2088 = vmatpush1.bf16.msra.mxu1 %v2574_v53 }
 0x481   :  { %2050 = vmatprep.subr.bf16.mxu0 %v2556_v27  ;;  %2090 = vmatprep.subr.bf16.mxu1 %v2577_v56 }
 0x484   :  { %2052 = vmatpush1.bf16.msra.mxu0 %v2565_v41  ;;  %2092 = vmatpush1.bf16.msra.mxu1 %v2589_v5 }
 0x485   :  { %2054 = vmatprep.subr.bf16.mxu0 %v2571_v47  ;;  %2094 = vmatprep.subr.bf16.mxu1 %v2592_v7 }
 0x488   :  { %2056 = vmatpush1.bf16.msra.mxu0 %v2583_v63  ;;  %2096 = vmatpush1.bf16.msra.mxu1 %v2599_v20 }
 0x489   :  { %2058 = vmatprep.subr.bf16.mxu0 %v2586_v1  ;;  %2098 = vmatprep.subr.bf16.mxu1 %v2602_v21 }
 0x48c   :  { %2060 = vmatpush1.bf16.msra.mxu0 %v2595_v19  ;;  %2100 = vmatpush1.bf16.msra.mxu1 %v2606_v31 }
 0x48d   :  { %2102 = vmatprep.subr.bf16.mxu0 %v2480_v4  ;;  %2142 = vmatprep.subr.bf16.mxu1 %v2493_v22 }
 0x53a   :  { %v921_v3 = vpop.f32.mrb[8].mxu0  ;;  %v992_v18 = vpop.f32.mrb[8].mxu1 }
 0x53b   :  { %v922_v28 = vadd.f32 %v921_v3, %v2661_v49  ;;  %v923_v29 = vpop.f32.mrb[9].mxu0  ;;  %v994_v34 = vpop.f32.mrb[9].mxu1  ;;  %v993_v54 = vadd.f32 %v992_v18, %v2670_v23 }
 0x53c   :  { %v924_v38 = vadd.f32 %v923_v29, %v2663_v50  ;;  %v995_v36 = vadd.f32 %v994_v34, %v2667_v2 }
 0x53d   :  { %v1600_v39 = vmul.f32 -1.442695, %v922_v28 }
 0x53e   :  { %v1601_v40 = vmul.f32 -1.442695, %v924_v38  ;;  %v1602_v51 = vmul.f32 -1.442695, %v995_v36 }
 0x53f   :  { %2330 = vpow2.f32 %v1600_v39 }
 0x540   :  { %2332 = vpow2.f32 %v1601_v40  ;;  %v1021_v40 = vld [vmem:[#allocation6] sm:$0x3f] }
 0x541   :  { %2334 = vpow2.f32 %v1602_v51 }
 0x542   :  { %2336 = vtanh.f32 %v993_v54  ;;  %v1615_v54 = vld [vmem:[%s3007_s0 + $0x38] sm:$0x3f]  ;;  %s2446_s0 = smov [#allocation6]  }
 0x543   :  { %s1565_s15 = sshll.u32 %s2446_s0, 4  ;;  %s1566_s15 = int_to_ptr.vmem [resolvable:$true] %s1565_s15 }
 0x544   :  { %s2416_s16 = scalar_lea.vmem %s1566_s15, 128  ;;  %p2421_p9 = scmp.lt.s32.totalorder %s1566_s15, %s1566_s15 }
 0x545   :  { %p2417_p8 = scmp.ne.s32.totalorder %s1566_s15, %s2416_s16  ;;  %p2422_p10 = scmp.lt.s32.totalorder %s2416_s16, %s2416_s16 }
 0x547   :  { %p2423_p11 = por %p2422_p10, %p2421_p9 }
 0x549   :  { %v2331_v44 = vpop.eup %2330  ;;  %p2424_p12 = pnand %p2423_p11, %p2417_p8 }
 0x54a   :  { %v2333_v59 = vpop.eup %2332  ;;  %v1000_v43 = vadd.f32 1.0, %v2331_v44 }
 0x54b   :  { %v1006_v60 = vadd.f32 1.0, %v2333_v59  ;;  %v2335_v61 = vpop.eup %2334 }
 0x54c   :  { %2338 = vrcp.f32 %v1000_v43  ;;  %v2337_v11 = vpop.eup %2336  ;;  %v1013_v28 = vadd.f32 1.0, %v2335_v61 }
 0x54d   :  { %2340 = vrcp.f32 %v1006_v60 }
 0x54e   :  { %2342 = vrcp.f32 %v1013_v28 }
 0x556   :  { %v2339_v13 = vpop.eup %2338 }
 0x557   :  { %v2341_v12 = vpop.eup %2340  ;;  %v1017_v3 = vmul.f32 %v2339_v13, %v2337_v11 }
 0x558   :  { %v1016_v29 = vmul.f32 %v2341_v12, %v2835_v57  ;;  %v2343_v18 = vpop.eup %2342  ;;  %v1207_v57 = vld [vmem:[#allocation2 + $0x8] sm:$0x3f] }
 0x559   :  { %1383 = vst.msk [vmem:[#allocation2 + $0x8] sm:$0x3f] %vm111_vm0, %v1615_v54 }
 0x55a   :  { %v2889_v34 = vadd.f32 %v1017_v3, %v1016_v29 }
 0x55c   :  { %2344 = vtanh.f32 %v2889_v34 }
 0x566   :  { %v2345_v38 = vpop.eup %2344 }
 0x567   :  { %v1020_v39 = vmul.f32 %v2345_v38, %v2343_v18 }
 0x569   :  { %v1022_v36 = vadd.f32 %v1021_v40, %v1020_v39  ;;  %1024 = vst [vmem:[#allocation2] sm:$0x3f] %v1020_v39 }
 0x56b   :  { %1023 = vst [vmem:[#allocation6] sm:$0x3f] %v1022_v36 }
 0x570   :  { %v1028_v51 = vld [vmem:[#allocation2] sm:$0x3f] }
 0x571   :  { %1098 = vmatmul.mubr.f32.vlgmr.msra.gmra.mrb[10].mxu0 %v1028_v51  ;;  %1169 = vmatmul.mubr.f32.vlgmr.msra.gmra.mrb[10].mxu1 %v1028_v51 }
 0x572   :  { %2104 = vmatpush1.bf16.msra.mxu0 %v2482_v8  ;;  %2144 = vmatpush1.bf16.msra.mxu1 %v2495_v25 }
 0x573   :  { %2106 = vmatprep.subr.bf16.mxu0 %v2484_v9  ;;  %2146 = vmatprep.subr.bf16.mxu1 %v2505_v33 }
 0x574   :  { %1610 = vmatprep.mubr.msk.f32.mxu0 %vm139_vm1, %v1207_v57  ;;  %1611 = vmatprep.mubr.msk.f32.mxu1 %vm139_vm1, %v1207_v57 }
 0x576   :  { %2108 = vmatpush1.bf16.msra.mxu0 %v2488_v14  ;;  %2148 = vmatpush1.bf16.msra.mxu1 %v2507_v37 }
 0x577   :  { %2110 = vmatprep.subr.bf16.mxu0 %v2491_v17  ;;  %2150 = vmatprep.subr.bf16.mxu1 %v2513_v45 }
 0x57a   :  { %2112 = vmatpush1.bf16.msra.mxu0 %v2498_v26  ;;  %2152 = vmatpush1.bf16.msra.mxu1 %v2519_v48 }
 0x57b   :  { %2114 = vmatprep.subr.bf16.mxu0 %v2502_v30  ;;  %2154 = vmatprep.subr.bf16.mxu1 %v2522_v52 }
 0x57e   :  { %2116 = vmatpush1.bf16.msra.mxu0 %v2511_v42  ;;  %2156 = vmatpush1.bf16.msra.mxu1 %v2531_v62 }
 0x57f   :  { %2118 = vmatprep.subr.bf16.mxu0 %v2516_v46  ;;  %2158 = vmatprep.subr.bf16.mxu1 %v2534_v0 }
 0x582   :  { %2120 = vmatpush1.bf16.msra.mxu0 %v2525_v55  ;;  %2160 = vmatpush1.bf16.msra.mxu1 %v2543_v15 }
 0x583   :  { %2122 = vmatprep.subr.bf16.mxu0 %v2528_v58  ;;  %2162 = vmatprep.subr.bf16.mxu1 %v2546_v16 }
 0x586   :  { %2124 = vmatpush1.bf16.msra.mxu0 %v2537_v6  ;;  %2164 = vmatpush1.bf16.msra.mxu1 %v2559_v32 }
 0x587   :  { %2126 = vmatprep.subr.bf16.mxu0 %v2540_v10  ;;  %2166 = vmatprep.subr.bf16.mxu1 %v2562_v35 }
 0x58a   :  { %2128 = vmatpush1.bf16.msra.mxu0 %v2553_v24  ;;  %2168 = vmatpush1.bf16.msra.mxu1 %v2574_v53 }
 0x58b   :  { %2130 = vmatprep.subr.bf16.mxu0 %v2556_v27  ;;  %2170 = vmatprep.subr.bf16.mxu1 %v2577_v56 }
 0x58e   :  { %2132 = vmatpush1.bf16.msra.mxu0 %v2565_v41  ;;  %2172 = vmatpush1.bf16.msra.mxu1 %v2589_v5 }
 0x58f   :  { %2134 = vmatprep.subr.bf16.mxu0 %v2571_v47  ;;  %2174 = vmatprep.subr.bf16.mxu1 %v2592_v7 }
 0x592   :  { %2136 = vmatpush1.bf16.msra.mxu0 %v2583_v63  ;;  %2176 = vmatpush1.bf16.msra.mxu1 %v2599_v20 }
 0x593   :  { %2138 = vmatprep.subr.bf16.mxu0 %v2586_v1  ;;  %2178 = vmatprep.subr.bf16.mxu1 %v2602_v21 }
 0x596   :  { %2140 = vmatpush1.bf16.msra.mxu0 %v2595_v19  ;;  %2180 = vmatpush1.bf16.msra.mxu1 %v2606_v31 }
 0x597   :  { %2182 = vmatprep.subr.bf16.mxu0 %v2480_v4  ;;  %2222 = vmatprep.subr.bf16.mxu1 %v2493_v22 }
 0x644   :  { %v1099_v44 = vpop.f32.mrb[10].mxu0  ;;  %v1170_v59 = vpop.f32.mrb[10].mxu1 }
 0x645   :  { %v1100_v43 = vadd.f32 %v1099_v44, %v2661_v49  ;;  %v1101_v60 = vpop.f32.mrb[11].mxu0  ;;  %v1172_v61 = vpop.f32.mrb[11].mxu1  ;;  %v1171_v3 = vadd.f32 %v1170_v59, %v2670_v23 }
 0x646   :  { %v1102_v4 = vadd.f32 %v1101_v60, %v2663_v50  ;;  %v1173_v13 = vadd.f32 %v1172_v61, %v2667_v2 }
 0x647   :  { %v1606_v22 = vmul.f32 -1.442695, %v1100_v43 }
 0x648   :  { %v1607_v11 = vmul.f32 -1.442695, %v1102_v4  ;;  %v1608_v12 = vmul.f32 -1.442695, %v1173_v13  ;;  %v1199_v4 = vld [vmem:[#allocation6] sm:$0x3f] }
 0x649   :  { %2346 = vpow2.f32 %v1606_v22 }
 0x64a   :  { %2348 = vpow2.f32 %v1607_v11 }
 0x64b   :  { %2350 = vpow2.f32 %v1608_v12 }
 0x64c   :  { %2352 = vtanh.f32 %v1171_v3 }
 0x653   :  { %v2347_v28 = vpop.eup %2346 }
 0x654   :  { %v2349_v29 = vpop.eup %2348  ;;  %v1178_v18 = vadd.f32 1.0, %v2347_v28 }
 0x655   :  { %v1184_v38 = vadd.f32 1.0, %v2349_v29  ;;  %v2351_v39 = vpop.eup %2350 }
 0x656   :  { %2354 = vrcp.f32 %v1178_v18  ;;  %v2353_v40 = vpop.eup %2352  ;;  %v1191_v54 = vadd.f32 1.0, %v2351_v39 }
 0x657   :  { %2356 = vrcp.f32 %v1184_v38 }
 0x658   :  { %2358 = vrcp.f32 %v1191_v54 }
 0x660   :  { %v2355_v36 = vpop.eup %2354 }
 0x661   :  { %v2357_v51 = vpop.eup %2356  ;;  %v1195_v57 = vmul.f32 %v2355_v36, %v2353_v40 }
 0x662   :  { %v1194_v44 = vmul.f32 %v2357_v51, %v2889_v34  ;;  %v2359_v59 = vpop.eup %2358 }
 0x664   :  { %v2943_v43 = vadd.f32 %v1195_v57, %v1194_v44 }
 0x666   :  { %2360 = vtanh.f32 %v2943_v43 }
 0x670   :  { %v2361_v60 = vpop.eup %2360 }
 0x671   :  { %v1198_v61 = vmul.f32 %v2361_v60, %v2359_v59 }
 0x673   :  { %v1200_v22 = vadd.f32 %v1199_v4, %v1198_v61  ;;  %1202 = vst [vmem:[#allocation2] sm:$0x3f] %v1198_v61 }
 0x675   :  { %1201 = vst [vmem:[#allocation6] sm:$0x3f] %v1200_v22 }
 0x67a   :  { %v1206_v11 = vld [vmem:[#allocation2] sm:$0x3f] }
 0x67b   :  { %1276 = vmatmul.mubr.f32.vlgmr.msra.gmra.mrb[12].mxu0 %v1206_v11  ;;  %1347 = vmatmul.mubr.f32.vlgmr.msra.gmra.mrb[12].mxu1 %v1206_v11 }
 0x67c   :  { %2184 = vmatpush1.bf16.msra.mxu0 %v2482_v8  ;;  %2224 = vmatpush1.bf16.msra.mxu1 %v2495_v25  ;;  %v1385_v8 = vld [vmem:[#allocation2 + $0x8] sm:$0x3f] }
 0x67d   :  { %2186 = vmatprep.subr.bf16.mxu0 %v2484_v9  ;;  %2226 = vmatprep.subr.bf16.mxu1 %v2505_v33 }
 0x67e   :  { %1616 = vmatprep.mubr.msk.f32.mxu0 %vm139_vm1, %v1385_v8  ;;  %1617 = vmatprep.mubr.msk.f32.mxu1 %vm139_vm1, %v1385_v8 }
 0x680   :  { %2188 = vmatpush1.bf16.msra.mxu0 %v2488_v14  ;;  %2228 = vmatpush1.bf16.msra.mxu1 %v2507_v37 }
 0x681   :  { %2190 = vmatprep.subr.bf16.mxu0 %v2491_v17  ;;  %2230 = vmatprep.subr.bf16.mxu1 %v2513_v45 }
 0x684   :  { %2192 = vmatpush1.bf16.msra.mxu0 %v2498_v26  ;;  %2232 = vmatpush1.bf16.msra.mxu1 %v2519_v48 }
 0x685   :  { %2194 = vmatprep.subr.bf16.mxu0 %v2502_v30  ;;  %2234 = vmatprep.subr.bf16.mxu1 %v2522_v52 }
 0x688   :  { %2196 = vmatpush1.bf16.msra.mxu0 %v2511_v42  ;;  %2236 = vmatpush1.bf16.msra.mxu1 %v2531_v62 }
 0x689   :  { %2198 = vmatprep.subr.bf16.mxu0 %v2516_v46  ;;  %2238 = vmatprep.subr.bf16.mxu1 %v2534_v0 }
 0x68c   :  { %2200 = vmatpush1.bf16.msra.mxu0 %v2525_v55  ;;  %2240 = vmatpush1.bf16.msra.mxu1 %v2543_v15 }
 0x68d   :  { %2202 = vmatprep.subr.bf16.mxu0 %v2528_v58  ;;  %2242 = vmatprep.subr.bf16.mxu1 %v2546_v16 }
 0x690   :  { %2204 = vmatpush1.bf16.msra.mxu0 %v2537_v6  ;;  %2244 = vmatpush1.bf16.msra.mxu1 %v2559_v32 }
 0x691   :  { %2206 = vmatprep.subr.bf16.mxu0 %v2540_v10  ;;  %2246 = vmatprep.subr.bf16.mxu1 %v2562_v35 }
 0x694   :  { %2208 = vmatpush1.bf16.msra.mxu0 %v2553_v24  ;;  %2248 = vmatpush1.bf16.msra.mxu1 %v2574_v53 }
 0x695   :  { %2210 = vmatprep.subr.bf16.mxu0 %v2556_v27  ;;  %2250 = vmatprep.subr.bf16.mxu1 %v2577_v56 }
 0x698   :  { %2212 = vmatpush1.bf16.msra.mxu0 %v2565_v41  ;;  %2252 = vmatpush1.bf16.msra.mxu1 %v2589_v5 }
 0x699   :  { %2214 = vmatprep.subr.bf16.mxu0 %v2571_v47  ;;  %2254 = vmatprep.subr.bf16.mxu1 %v2592_v7  ;;  %v1377_v47 = vld [vmem:[#allocation6] sm:$0x3f] }
 0x69c   :  { %2216 = vmatpush1.bf16.msra.mxu0 %v2583_v63  ;;  %2256 = vmatpush1.bf16.msra.mxu1 %v2599_v20 }
 0x69d   :  { %2218 = vmatprep.subr.bf16.mxu0 %v2586_v1  ;;  %2258 = vmatprep.subr.bf16.mxu1 %v2602_v21 }
 0x6a0   :  { %2220 = vmatpush1.bf16.msra.mxu0 %v2595_v19  ;;  %2260 = vmatpush1.bf16.msra.mxu1 %v2606_v31 }
 0x74e   :  { %v1277_v9 = vpop.f32.mrb[12].mxu0  ;;  %v1348_v14 = vpop.f32.mrb[12].mxu1 }
 0x74f   :  { %v1278_v17 = vadd.f32 %v1277_v9, %v2661_v49  ;;  %v1279_v25 = vpop.f32.mrb[13].mxu0  ;;  %v1350_v26 = vpop.f32.mrb[13].mxu1  ;;  %v1349_v46 = vadd.f32 %v1348_v14, %v2670_v23 }
 0x750   :  { %v1280_v30 = vadd.f32 %v1279_v25, %v2663_v50  ;;  %v1351_v42 = vadd.f32 %v1350_v26, %v2667_v2 }
 0x751   :  { %v1612_v33 = vmul.f32 -1.442695, %v1278_v17 }
 0x752   :  { %v1613_v37 = vmul.f32 -1.442695, %v1280_v30  ;;  %v1614_v45 = vmul.f32 -1.442695, %v1351_v42 }
 0x753   :  { %2362 = vpow2.f32 %v1612_v33 }
 0x754   :  { %2364 = vpow2.f32 %v1613_v37 }
 0x755   :  { %2366 = vpow2.f32 %v1614_v45 }
 0x756   :  { %2368 = vtanh.f32 %v1349_v46 }
 0x75d   :  { %v2363_v48 = vpop.eup %2362 }
 0x75e   :  { %v2365_v52 = vpop.eup %2364  ;;  %v1356_v55 = vadd.f32 1.0, %v2363_v48 }
 0x75f   :  { %v1362_v58 = vadd.f32 1.0, %v2365_v52  ;;  %v2367_v62 = vpop.eup %2366 }
 0x760   :  { %2370 = vrcp.f32 %v1356_v55  ;;  %v2369_v0 = vpop.eup %2368  ;;  %v1369_v16 = vadd.f32 1.0, %v2367_v62 }
 0x761   :  { %2372 = vrcp.f32 %v1362_v58 }
 0x762   :  { %2374 = vrcp.f32 %v1369_v16 }
 0x76a   :  { %v2371_v6 = vpop.eup %2370 }
 0x76b   :  { %v2373_v10 = vpop.eup %2372  ;;  %v1373_v15 = vmul.f32 %v2371_v6, %v2369_v0 }
 0x76c   :  { %v1372_v24 = vmul.f32 %v2373_v10, %v2943_v43  ;;  %v2375_v32 = vpop.eup %2374 }
 0x76e   :  { %v1374_v27 = vadd.f32 %v1373_v15, %v1372_v24 }
 0x770   :  { %2376 = vtanh.f32 %v1374_v27 }
 0x77a   :  { %v2377_v35 = vpop.eup %2376 }
 0x77b   :  { %v1376_v41 = vmul.f32 %v2377_v35, %v2375_v32 }
 0x77d   :  { %v1378_v53 = vadd.f32 %v1377_v47, %v1376_v41  ;;  %1380 = vst [vmem:[#allocation2] sm:$0x3f] %v1376_v41 }
 0x77f   :  { %1379 = vst [vmem:[#allocation6] sm:$0x3f] %v1378_v53 }
 0x784   :  { %v1384_v56 = vld [vmem:[#allocation2] sm:$0x3f] }
 0x785   :  { %1454 = vmatmul.mubr.f32.vlgmr.msra.gmra.mrb[14].mxu0 %v1384_v56  ;;  %1525 = vmatmul.mubr.f32.vlgmr.msra.gmra.mrb[14].mxu1 %v1384_v56 }
 0x786   :  { %v1555_v44 = vld [vmem:[#allocation6] sm:$0x3f] }
 0x858   :  { %v1455_v63 = vpop.f32.mrb[14].mxu0  ;;  %v1526_v1 = vpop.f32.mrb[14].mxu1 }
 0x859   :  { %v1456_v5 = vadd.f32 %v1455_v63, %v2661_v49  ;;  %v1457_v7 = vpop.f32.mrb[15].mxu0  ;;  %v1528_v19 = vpop.f32.mrb[15].mxu1  ;;  %v1527_v12 = vadd.f32 %v1526_v1, %v2670_v23 }
 0x85a   :  { %v1458_v20 = vadd.f32 %v1457_v7, %v2663_v50  ;;  %v1529_v34 = vadd.f32 %v1528_v19, %v2667_v2 }
 0x85b   :  { %v1618_v21 = vmul.f32 -1.442695, %v1456_v5 }
 0x85c   :  { %v1619_v31 = vmul.f32 -1.442695, %v1458_v20  ;;  %v1620_v13 = vmul.f32 -1.442695, %v1529_v34 }
 0x85d   :  { %2378 = vpow2.f32 %v1618_v21 }
 0x85e   :  { %2380 = vpow2.f32 %v1619_v31 }
 0x85f   :  { %2382 = vpow2.f32 %v1620_v13 }
 0x860   :  { %2384 = vtanh.f32 %v1527_v12 }
 0x867   :  { %v2379_v3 = vpop.eup %2378 }
 0x868   :  { %v2381_v28 = vpop.eup %2380  ;;  %v1534_v29 = vadd.f32 1.0, %v2379_v3 }
 0x869   :  { %v1540_v18 = vadd.f32 1.0, %v2381_v28  ;;  %v2383_v49 = vpop.eup %2382 }
 0x86a   :  { %2386 = vrcp.f32 %v1534_v29  ;;  %v2385_v38 = vpop.eup %2384  ;;  %v1547_v36 = vadd.f32 1.0, %v2383_v49 }
 0x86b   :  { %2388 = vrcp.f32 %v1540_v18 }
 0x86c   :  { %2390 = vrcp.f32 %v1547_v36 }
 0x874   :  { %v2387_v50 = vpop.eup %2386 }
 0x875   :  { %v2389_v39 = vpop.eup %2388  ;;  %v1551_v40 = vmul.f32 %v2387_v50, %v2385_v38 }
 0x876   :  { %v1550_v51 = vmul.f32 %v2389_v39, %v1374_v27  ;;  %v2391_v2 = vpop.eup %2390 }
 0x878   :  { %v1552_v57 = vadd.f32 %v1551_v40, %v1550_v51 }
 0x87a   :  { %2392 = vtanh.f32 %v1552_v57 }
 0x884   :  { %v2393_v23 = vpop.eup %2392 }
 0x885   :  { %v1554_v54 = vmul.f32 %v2393_v23, %v2391_v2 }
 0x887   :  { %v1556_v43 = vadd.f32 %v1555_v44, %v1554_v54  ;;  %1558 = vst [vmem:[#allocation2] sm:$0x3f] %v1554_v54 }
 0x889   :  { %1557 = vst [vmem:[#allocation6] sm:$0x3f] %v1556_v43 }
 0x88a   :  { %2427 = shalt.err (!%p2424_p12)
}
 0x88b   :  { %s2428_s19 = scalar_lea.hbm %s3010_s3, 128 }
 0x88c   :  { %p2429_p13 = scmp.ne.s32.totalorder %s3010_s3, %s2428_s19  ;;  %p2432_p0 = scmp.lt.u32.totalorder %s2428_s19, %s3010_s3 }
 0x88e   :  { %p2434_p1 = pnand %p2432_p0, %p2429_p13 }
 0x890   :  { %2437 = shalt.err (!%p2434_p1)
}
 0x891   :  { %1568 = dma.vmem_to_hbm [thread:$0]  %s1566_s15, 128, %s3010_s3, [#allocation5]  }
 0x892   :  { %2440 = dma.done.wait [#allocation5], 128  }
 0x893   :  { %2441 = vsyncadd [#allocation5], 4294967168 }
 0x894   :  { %1572 = vsyncpa [#allocation4], 1 }
 0x895   :  { %1573 = vsyncpa [#allocation5], 1 }

</bundles_post_ra>
